<compile_context>
chip_gen: v5e
topology: v5e:2x2
jax: 0.10.0
libtpu: 0.0.40
codegen_flags: <defaults>
</compile_context>

<pallas_src>
import functools

import jax
import jax.numpy as jnp
from jax import lax
from jax.experimental import pallas as pl
from jax.experimental.pallas import tpu as pltpu

# ----------------------------- model config --------------------------------
VOCAB = 64          # stands in for tokenizer.vocab_size (32100 in t5-base)
D_MODEL = 32
NUM_HEADS = 2
D_KV = 16
INNER = NUM_HEADS * D_KV
D_FF = 64
NUM_BUCKETS = 8
MAX_DIST = 16
PAD_ID = 0          # t5 pad_token_id == decoder_start_token_id == 0
ENC_EMB_SCALE = 1.0
EPS = 1e-6
NEG_INF = -1e9      # additive-mask constant; make dtype-aware if masks go bf16

# MXU operand dtype.  Keep f32 at toy sizes; switch to jnp.bfloat16 on
# v6e/v7x once D_MODEL/D_FF/VOCAB reach real sizes (full-rate MXU, half the
# weight traffic).  Accumulation stays f32 via preferred_element_type.
MXU_DTYPE = jnp.float32


# ======================= in-kernel helper functions =========================
def _rms(x, w, eps):
    """T5 RMSNorm (no mean subtraction, no bias). x: [N, D], w: [1, D]."""
    var = jnp.mean(x * x, axis=-1, keepdims=True)
    return x * lax.rsqrt(var + eps) * w


def _mm(a, b):
    """a @ b on the MXU with f32 accumulation."""
    return jnp.dot(a.astype(MXU_DTYPE), b.astype(MXU_DTYPE),
                   preferred_element_type=jnp.float32)


def _mm_nt(a, b):
    """a @ b.T (contract last dims of both) without materializing b.T."""
    return lax.dot_general(a.astype(MXU_DTYPE), b.astype(MXU_DTYPE),
                           (((1,), (1,)), ((), ())),
                           preferred_element_type=jnp.float32)


def _attn_core(q, k, v, wo, bias):
    """Multi-head attention + output projection, heads unrolled statically.

    q: [Sq, INNER], k/v: [Sk, INNER], wo: [INNER, D_MODEL]
    bias: additive [H, Sq, Sk] (pos+mask already combined) or 2-D
          broadcastable-to-[Sq, Sk] (cross-attention, no position bias).
    Returns [Sq, D_MODEL].  (T5 does NOT scale scores by 1/sqrt(dk).)
    """
    ctxs = []
    for h in range(NUM_HEADS):
        sl = slice(h * D_KV, (h + 1) * D_KV)
        s = _mm_nt(q[:, sl], k[:, sl])                      # [Sq, Sk]
        s = s + (bias[h] if bias.ndim == 3 else bias)       # single add / head
        m = jnp.max(s, axis=-1, keepdims=True)
        p = jnp.exp(s - m)
        p = p * pl.reciprocal(jnp.sum(p, axis=-1, keepdims=True), approx=True)
        ctxs.append(_mm(p, v[:, sl]))                       # [Sq, D_KV]
    ctx = jnp.concatenate(ctxs, axis=-1)                    # [Sq, INNER]
    return _mm(ctx, wo)                                     # one O-projection


# ============================ fused Pallas kernel ============================
def _t5_fused_kernel(inp_ref, dec_ref, enc_pos_ref, dec_pos_ref,
                     enc_mask_ref, dec_mask_ref, labels_ref,
                     e_ln1_ref, e_wqkv_ref, e_wo_ref, e_ln2_ref,
                     e_wi_ref, e_wof_ref, e_lnf_ref,
                     d_ln1_ref, d_sa_wqkv_ref, d_sa_wo_ref, d_ln2_ref,
                     d_ca_wq_ref, d_ca_wkv_ref, d_ca_wo_ref, d_ln3_ref,
                     d_wi_ref, d_wof_ref, d_lnf_ref, emb_ref,
                     logits_ref, loss_ref, *, eps, scale, B, Se, Sd):
    """Entire T5 forward (enc layer, enc LN, dec layer, LM head, CE loss)."""
    enc_pos = enc_pos_ref[...]                  # [H, Se, Se]
    dec_pos = dec_pos_ref[...]                  # [H, Sd, Sd]
    enc_mask = enc_mask_ref[...]                # [B, 1, Se] additive
    dec_mask = dec_mask_ref[...]                # [B, Sd, Sd] additive causal

    # ---------------- encoder layer (self-attn + FFN) ----------------
    x = inp_ref[...].astype(jnp.float32)        # [B*Se, D]
    normed = _rms(x, e_ln1_ref[...], eps)
    qkv = _mm(normed, e_wqkv_ref[...])          # [B*Se, 3*INNER]
    wo = e_wo_ref[...]
    attn = []
    for b in range(B):
        r = slice(b * Se, (b + 1) * Se)
        bias = enc_pos + enc_mask[b][None]      # [H, Se, Se]
        attn.append(_attn_core(qkv[r, :INNER], qkv[r, INNER:2 * INNER],
                               qkv[r, 2 * INNER:], wo, bias))
    x = x + jnp.concatenate(attn, axis=0)
    normed = _rms(x, e_ln2_ref[...], eps)
    hh = jnp.maximum(_mm(normed, e_wi_ref[...]), 0.0)
    x = x + _mm(hh, e_wof_ref[...])
    enc_h = _rms(x, e_lnf_ref[...], eps)        # encoder output [B*Se, D]

    # ---------------- decoder layer (self + cross + FFN) ----------------
    y = dec_ref[...].astype(jnp.float32)        # [B*Sd, D]

    # self-attention (causal, with relative-position bias)
    normed = _rms(y, d_ln1_ref[...], eps)
    qkv = _mm(normed, d_sa_wqkv_ref[...])
    wo = d_sa_wo_ref[...]
    attn = []
    for b in range(B):
        r = slice(b * Sd, (b + 1) * Sd)
        bias = dec_pos + dec_mask[b][None]      # [H, Sd, Sd]
        attn.append(_attn_core(qkv[r, :INNER], qkv[r, INNER:2 * INNER],
                               qkv[r, 2 * INNER:], wo, bias))
    y = y + jnp.concatenate(attn, axis=0)

    # cross-attention (K/V from encoder output, no position bias)
    normed = _rms(y, d_ln2_ref[...], eps)
    q_all = _mm(normed, d_ca_wq_ref[...])       # [B*Sd, INNER]
    kv_all = _mm(enc_h, d_ca_wkv_ref[...])      # [B*Se, 2*INNER]
    wo = d_ca_wo_ref[...]
    attn = []
    for b in range(B):
        rq = slice(b * Sd, (b + 1) * Sd)
        rk = slice(b * Se, (b + 1) * Se)
        attn.append(_attn_core(q_all[rq], kv_all[rk, :INNER],
                               kv_all[rk, INNER:], wo, enc_mask[b]))
    y = y + jnp.concatenate(attn, axis=0)

    # FFN
    normed = _rms(y, d_ln3_ref[...], eps)
    hh = jnp.maximum(_mm(normed, d_wi_ref[...]), 0.0)
    y = y + _mm(hh, d_wof_ref[...])

    # -------- final RMSNorm + tied LM head (d_model**-0.5) + CE loss --------
    normed = _rms(y, d_lnf_ref[...], eps) * scale
    logits = _mm_nt(normed, emb_ref[...])       # [B*Sd, V] (emb untransposed)
    logits_ref[...] = logits

    labels = labels_ref[...]                    # [B*Sd, 1] int32
    m = jnp.max(logits, axis=-1, keepdims=True)
    z = logits - m
    lse = jnp.log(jnp.sum(jnp.exp(z), axis=-1, keepdims=True))
    logp = z - lse                              # [N, V]
    vocab_ids = lax.broadcasted_iota(jnp.int32, logits.shape, 1)
    onehot = (vocab_ids == labels).astype(jnp.float32)
    nll = -jnp.sum(logp * onehot, axis=-1, keepdims=True)          # [N, 1]
    valid = (labels != -100).astype(jnp.float32)                   # ignore_index
    total = jnp.sum(nll * valid, axis=0, keepdims=True)            # [1, 1]
    count = jnp.sum(valid, axis=0, keepdims=True)                  # [1, 1]
    # TODO(synk): torch CE(mean) returns NaN when every label is -100; we
    #             return 0 in that degenerate case.
    # TODO(synk): emit loss via an SMEM (1,1) out_spec instead of a padded
    #             VMEM tile once the vector->scalar store path is verified.
    loss_ref[...] = total / jnp.maximum(count, 1.0)


def _matmul_kernel(a_ref, b_ref, o_ref, acc_ref):
    @pl.when(pl.program_id(0) == 0)
    def _():
        acc_ref[...] = jnp.zeros_like(acc_ref)
    acc_ref[...] += jnp.dot(a_ref[...].astype(MXU_DTYPE),
                            b_ref[...].astype(MXU_DTYPE),
                            preferred_element_type=jnp.float32)
    @pl.when(pl.program_id(0) == pl.num_programs(0) - 1)
    def _():
        o_ref[...] = acc_ref[...]


# ============================ kernel wrappers ===============================
def _full_spec(shape):
    """Whole-array VMEM block for a grid=(1,) kernel."""
    nd = len(shape)
    return pl.BlockSpec(tuple(shape), lambda *_: (0,) * nd)


def pl_t5_fused(params, inp_emb, dec_emb, enc_pos, dec_pos,
                enc_mask, dec_self_mask, labels):
    """Single fused pallas_call for the whole forward. Returns (logits, loss)."""
    B, Se, D = inp_emb.shape
    Sd = dec_emb.shape[1]
    N = B * Sd
    V = params["emb"].shape[0]
    enc = params["enc"]["layers"][0]
    dec = params["dec"]["layers"][0]

    operands = [
        inp_emb.reshape(B * Se, D),                    # encoder input slab
        dec_emb.reshape(B * Sd, D),                    # decoder input slab
        enc_pos,                                       # [H, Se, Se]
        dec_pos,                                       # [H, Sd, Sd]
        enc_mask,                                      # [B, 1, Se]
        dec_self_mask,                                 # [B, Sd, Sd]
        labels.reshape(N, 1).astype(jnp.int32),        # [N, 1]
        enc["ln1"].reshape(1, D), enc["wqkv"], enc["wo"],
        enc["ln2"].reshape(1, D), enc["wi"], enc["wo_ffn"],
        params["enc"]["final_ln"].reshape(1, D),
        dec["ln1"].reshape(1, D), dec["sa_wqkv"], dec["sa_wo"],
        dec["ln2"].reshape(1, D), dec["ca_wq"], dec["ca_wkv"], dec["ca_wo"],
        dec["ln3"].reshape(1, D), dec["wi"], dec["wo_ffn"],
        params["dec"]["final_ln"].reshape(1, D),
        params["emb"],                                 # [V, D] untransposed
    ]

    logits, loss = pl.pallas_call(
        functools.partial(_t5_fused_kernel, eps=EPS, scale=D_MODEL ** -0.5,
                          B=B, Se=Se, Sd=Sd),
        out_shape=(jax.ShapeDtypeStruct((N, V), jnp.float32),
                   jax.ShapeDtypeStruct((1, 1), jnp.float32)),
        grid=(1,),
        in_specs=[_full_spec(op.shape) for op in operands],
        out_specs=(_full_spec((N, V)), _full_spec((1, 1))),
    )(*operands)
    return logits.reshape(B, Sd, V), loss[0, 0]


def pl_matmul(a, b):
    """[M, K] @ [K, N] -> [M, N] with K-tiling (float soft-mask branch only)."""
    M, K = a.shape
    _, N = b.shape
    tk = K if K <= 512 else 512
    # TODO(synk): pad K when it is not a multiple of the tile (real 32k vocab).
    assert K % tk == 0
    return pl.pallas_call(
        _matmul_kernel,
        out_shape=jax.ShapeDtypeStruct((M, N), jnp.float32),
        grid=(K // tk,),
        in_specs=[pl.BlockSpec((M, tk), lambda k: (0, k)),
                  pl.BlockSpec((tk, N), lambda k: (k, 0))],
        out_specs=pl.BlockSpec((M, N), lambda k: (0, 0)),
        scratch_shapes=[pltpu.VMEM((M, N), jnp.float32)],
        compiler_params=pltpu.CompilerParams(
            dimension_semantics=("arbitrary",)),
    )(a.astype(jnp.float32), b.astype(jnp.float32))


# ============================ glue (plain JAX) ==============================
def embedding_forward(emb_weight, mask):
    """Semantics of Embedding_.forward:
       - 2-D integer ids  -> embedding lookup (gather; no one-hot matmul)
       - float soft mask  -> mask @ embedding.weight[:V_limit, :]
    """
    if mask.ndim == 2:
        assert jnp.issubdtype(mask.dtype, jnp.integer)
        return jnp.take(emb_weight, mask, axis=0)
    assert jnp.issubdtype(mask.dtype, jnp.floating)
    B, S, Vlim = mask.shape
    flat = pl_matmul(mask.reshape(-1, Vlim), emb_weight[:Vlim, :])
    return flat.reshape(B, S, D_MODEL)


def relative_position_bucket(relative_position, bidirectional, num_buckets,
                             max_distance):
    relative_buckets = 0
    if bidirectional:
        num_buckets //= 2
        relative_buckets += (relative_position > 0).astype(jnp.int32) * num_buckets
        relative_position = jnp.abs(relative_position)
    else:
        relative_position = -jnp.minimum(relative_position, 0)
    max_exact = num_buckets // 2
    is_small = relative_position < max_exact
    rp_f = jnp.maximum(relative_position, 1).astype(jnp.float32)
    rp_large = max_exact + (
        jnp.log(rp_f / max_exact) / jnp.log(max_distance / max_exact)
        * (num_buckets - max_exact)
    ).astype(jnp.int32)
    rp_large = jnp.minimum(rp_large, num_buckets - 1)
    relative_buckets = relative_buckets + jnp.where(is_small, relative_position,
                                                    rp_large)
    return relative_buckets


def compute_position_bias(rel_table, Sq, Sk, bidirectional):
    ctx = jnp.arange(Sq)[:, None]
    mem = jnp.arange(Sk)[None, :]
    buckets = relative_position_bucket(mem - ctx, bidirectional,
                                       NUM_BUCKETS, MAX_DIST)
    values = rel_table[buckets]                   # [Sq, Sk, H]
    return jnp.transpose(values, (2, 0, 1))       # [H, Sq, Sk]


def shift_right(labels):
    B = labels.shape[0]
    start = jnp.full((B, 1), PAD_ID, labels.dtype)   # decoder_start_token_id
    shifted = jnp.concatenate([start, labels[:, :-1]], axis=1)
    return jnp.where(shifted == -100, PAD_ID, shifted)


def t5_forward(params, input_ids, input_attn, target_ids, target_attn):
    """Mirrors T5.forward: embedding -> /enc_emb_scale -> model(...)."""
    B, Se = input_ids.shape
    Sd = target_ids.shape[1]

    # --- Embedding_ + scale (dropout == identity in eval) ---
    inp_emb = embedding_forward(params["emb"], input_ids) / ENC_EMB_SCALE
    dec_input_ids = shift_right(target_ids)
    dec_emb = embedding_forward(params["emb"], dec_input_ids)

    # --- masks & relative-position bias (tiny trace-time math) ---
    enc_pos = compute_position_bias(params["enc"]["rel"], Se, Se, True)
    dec_pos = compute_position_bias(params["dec"]["rel"], Sd, Sd, False)
    enc_mask = ((1.0 - input_attn.astype(jnp.float32)) * NEG_INF)[:, None, :]
    causal = jnp.tril(jnp.ones((Sd, Sd), jnp.float32))
    dec_self_mask = (1.0 - target_attn.astype(jnp.float32)[:, None, :]
                     * causal[None]) * NEG_INF                     # [B, Sd, Sd]

    # --- one fused kernel: enc layer + enc LN + dec layer + head + loss ---
    logits, loss = pl_t5_fused(params, inp_emb, dec_emb, enc_pos, dec_pos,
                               enc_mask, dec_self_mask, target_ids)
    return loss, logits


# ============================ parameter init ================================
def init_params(key):
    keys = iter(jax.random.split(key, 64))

    def nrm(shape, scale=0.05):
        return jax.random.normal(next(keys), shape, jnp.float32) * scale

    ones = jnp.ones((D_MODEL,), jnp.float32)
    enc_layer = {
        "ln1": ones,
        "wqkv": nrm((D_MODEL, 3 * INNER)),     # fused Q|K|V
        "wo": nrm((INNER, D_MODEL)),
        "ln2": ones,
        "wi": nrm((D_MODEL, D_FF)),
        "wo_ffn": nrm((D_FF, D_MODEL)),
    }
    dec_layer = {
        "ln1": ones,
        "sa_wqkv": nrm((D_MODEL, 3 * INNER)),  # fused Q|K|V (self-attn)
        "sa_wo": nrm((INNER, D_MODEL)),
        "ln2": ones,
        "ca_wq": nrm((D_MODEL, INNER)),
        "ca_wkv": nrm((D_MODEL, 2 * INNER)),   # fused K|V (cross-attn)
        "ca_wo": nrm((INNER, D_MODEL)),
        "ln3": ones,
        "wi": nrm((D_MODEL, D_FF)),
        "wo_ffn": nrm((D_FF, D_MODEL)),
    }
    params = {
        "emb": nrm((VOCAB, D_MODEL), scale=1.0),
        "enc": {"rel": nrm((NUM_BUCKETS, NUM_HEADS)),
                "layers": [enc_layer], "final_ln": ones},
        "dec": {"rel": nrm((NUM_BUCKETS, NUM_HEADS)),
                "layers": [dec_layer], "final_ln": ones},
    }
    return params


# ================================= main =====================================
if __name__ == "__main__":
    root = jax.random.PRNGKey(0)
    kp, k1, k2 = jax.random.split(root, 3)
    params = init_params(kp)

    B, Se, Sd = 2, 8, 8
    input_ids = jax.random.randint(k1, (B, Se), 1, VOCAB).astype(jnp.int32)
    target_ids = jax.random.randint(k2, (B, Sd), 1, VOCAB).astype(jnp.int32)
    input_attn = jnp.ones((B, Se), jnp.float32)
    target_attn = jnp.ones((B, Sd), jnp.float32)

    fwd = jax.jit(t5_forward)
    loss, logits = fwd(params, input_ids, input_attn, target_ids, target_attn)
    jax.block_until_ready((loss, logits))
    assert logits.shape == (B, Sd, VOCAB)
    assert bool(jnp.isfinite(loss)) and bool(jnp.all(jnp.isfinite(logits)))
    print("KERNEL_OK")
</pallas_src>

<mosaic_0001>
module attributes {stable_mosaic.version = 11 : i64} {
  func.func @_t5_fused_kernel(%arg0: i32, %arg1: memref<16x32xf32, #tpu.memory_space<vmem>>, %arg2: memref<16x32xf32, #tpu.memory_space<vmem>>, %arg3: memref<2x8x8xf32, #tpu.memory_space<vmem>>, %arg4: memref<2x8x8xf32, #tpu.memory_space<vmem>>, %arg5: memref<2x1x8xf32, #tpu.memory_space<vmem>>, %arg6: memref<2x8x8xf32, #tpu.memory_space<vmem>>, %arg7: memref<16x1xi32, #tpu.memory_space<vmem>>, %arg8: memref<1x32xf32, #tpu.memory_space<vmem>>, %arg9: memref<32x96xf32, #tpu.memory_space<vmem>>, %arg10: memref<32x32xf32, #tpu.memory_space<vmem>>, %arg11: memref<1x32xf32, #tpu.memory_space<vmem>>, %arg12: memref<32x64xf32, #tpu.memory_space<vmem>>, %arg13: memref<64x32xf32, #tpu.memory_space<vmem>>, %arg14: memref<1x32xf32, #tpu.memory_space<vmem>>, %arg15: memref<1x32xf32, #tpu.memory_space<vmem>>, %arg16: memref<32x96xf32, #tpu.memory_space<vmem>>, %arg17: memref<32x32xf32, #tpu.memory_space<vmem>>, %arg18: memref<1x32xf32, #tpu.memory_space<vmem>>, %arg19: memref<32x32xf32, #tpu.memory_space<vmem>>, %arg20: memref<32x64xf32, #tpu.memory_space<vmem>>, %arg21: memref<32x32xf32, #tpu.memory_space<vmem>>, %arg22: memref<1x32xf32, #tpu.memory_space<vmem>>, %arg23: memref<32x64xf32, #tpu.memory_space<vmem>>, %arg24: memref<64x32xf32, #tpu.memory_space<vmem>>, %arg25: memref<1x32xf32, #tpu.memory_space<vmem>>, %arg26: memref<64x32xf32, #tpu.memory_space<vmem>>, %arg27: memref<16x64xf32, #tpu.memory_space<vmem>>, %arg28: memref<1x1xf32, #tpu.memory_space<vmem>>) attributes {dimension_semantics = [#tpu.dimension_semantics<arbitrary>], iteration_bounds = array<i64: 1>, scalar_prefetch = 0 : i64, scratch_operands = 0 : i64, tpu.core_type = #tpu.core_type<tc>, window_params = [{pipeline_mode = #tpu.pipeline_mode<synchronous>, transform_indices = @transform_0, window_bounds = array<i64: 16, 32>}, {pipeline_mode = #tpu.pipeline_mode<synchronous>, transform_indices = @transform_1, window_bounds = array<i64: 16, 32>}, {pipeline_mode = #tpu.pipeline_mode<synchronous>, transform_indices = @transform_2, window_bounds = array<i64: 2, 8, 8>}, {pipeline_mode = #tpu.pipeline_mode<synchronous>, transform_indices = @transform_3, window_bounds = array<i64: 2, 8, 8>}, {pipeline_mode = #tpu.pipeline_mode<synchronous>, transform_indices = @transform_4, window_bounds = array<i64: 2, 1, 8>}, {pipeline_mode = #tpu.pipeline_mode<synchronous>, transform_indices = @transform_5, window_bounds = array<i64: 2, 8, 8>}, {pipeline_mode = #tpu.pipeline_mode<synchronous>, transform_indices = @transform_6, window_bounds = array<i64: 16, 1>}, {pipeline_mode = #tpu.pipeline_mode<synchronous>, transform_indices = @transform_7, window_bounds = array<i64: 1, 32>}, {pipeline_mode = #tpu.pipeline_mode<synchronous>, transform_indices = @transform_8, window_bounds = array<i64: 32, 96>}, {pipeline_mode = #tpu.pipeline_mode<synchronous>, transform_indices = @transform_9, window_bounds = array<i64: 32, 32>}, {pipeline_mode = #tpu.pipeline_mode<synchronous>, transform_indices = @transform_10, window_bounds = array<i64: 1, 32>}, {pipeline_mode = #tpu.pipeline_mode<synchronous>, transform_indices = @transform_11, window_bounds = array<i64: 32, 64>}, {pipeline_mode = #tpu.pipeline_mode<synchronous>, transform_indices = @transform_12, window_bounds = array<i64: 64, 32>}, {pipeline_mode = #tpu.pipeline_mode<synchronous>, transform_indices = @transform_13, window_bounds = array<i64: 1, 32>}, {pipeline_mode = #tpu.pipeline_mode<synchronous>, transform_indices = @transform_14, window_bounds = array<i64: 1, 32>}, {pipeline_mode = #tpu.pipeline_mode<synchronous>, transform_indices = @transform_15, window_bounds = array<i64: 32, 96>}, {pipeline_mode = #tpu.pipeline_mode<synchronous>, transform_indices = @transform_16, window_bounds = array<i64: 32, 32>}, {pipeline_mode = #tpu.pipeline_mode<synchronous>, transform_indices = @transform_17, window_bounds = array<i64: 1, 32>}, {pipeline_mode = #tpu.pipeline_mode<synchronous>, transform_indices = @transform_18, window_bounds = array<i64: 32, 32>}, {pipeline_mode = #tpu.pipeline_mode<synchronous>, transform_indices = @transform_19, window_bounds = array<i64: 32, 64>}, {pipeline_mode = #tpu.pipeline_mode<synchronous>, transform_indices = @transform_20, window_bounds = array<i64: 32, 32>}, {pipeline_mode = #tpu.pipeline_mode<synchronous>, transform_indices = @transform_21, window_bounds = array<i64: 1, 32>}, {pipeline_mode = #tpu.pipeline_mode<synchronous>, transform_indices = @transform_22, window_bounds = array<i64: 32, 64>}, {pipeline_mode = #tpu.pipeline_mode<synchronous>, transform_indices = @transform_23, window_bounds = array<i64: 64, 32>}, {pipeline_mode = #tpu.pipeline_mode<synchronous>, transform_indices = @transform_24, window_bounds = array<i64: 1, 32>}, {pipeline_mode = #tpu.pipeline_mode<synchronous>, transform_indices = @transform_25, window_bounds = array<i64: 64, 32>}, {pipeline_mode = #tpu.pipeline_mode<synchronous>, transform_indices = @transform_26, window_bounds = array<i64: 16, 64>}, {pipeline_mode = #tpu.pipeline_mode<synchronous>, transform_indices = @transform_27, window_bounds = array<i64: 1, 1>}]} {
    %c0 = arith.constant 0 : index
    %c0_0 = arith.constant 0 : index
    %c0_1 = arith.constant 0 : index
    %0 = vector.load %arg3[%c0, %c0_0, %c0_1] : memref<2x8x8xf32, #tpu.memory_space<vmem>>, vector<2x8x8xf32>
    %c0_2 = arith.constant 0 : index
    %c0_3 = arith.constant 0 : index
    %c0_4 = arith.constant 0 : index
    %1 = vector.load %arg4[%c0_2, %c0_3, %c0_4] : memref<2x8x8xf32, #tpu.memory_space<vmem>>, vector<2x8x8xf32>
    %c0_5 = arith.constant 0 : index
    %c0_6 = arith.constant 0 : index
    %c0_7 = arith.constant 0 : index
    %2 = vector.load %arg5[%c0_5, %c0_6, %c0_7] : memref<2x1x8xf32, #tpu.memory_space<vmem>>, vector<2x1x8xf32>
    %c0_8 = arith.constant 0 : index
    %c0_9 = arith.constant 0 : index
    %c0_10 = arith.constant 0 : index
    %3 = vector.load %arg6[%c0_8, %c0_9, %c0_10] : memref<2x8x8xf32, #tpu.memory_space<vmem>>, vector<2x8x8xf32>
    %c0_11 = arith.constant 0 : index
    %c0_12 = arith.constant 0 : index
    %4 = vector.load %arg1[%c0_11, %c0_12] : memref<16x32xf32, #tpu.memory_space<vmem>>, vector<16x32xf32>
    %c0_13 = arith.constant 0 : index
    %c0_14 = arith.constant 0 : index
    %5 = vector.load %arg8[%c0_13, %c0_14] : memref<1x32xf32, #tpu.memory_space<vmem>>, vector<1x32xf32>
    %6 = arith.mulf %4, %4 : vector<16x32xf32>
    %cst = arith.constant dense<0.000000e+00> : vector<16xf32>
    %7 = vector.multi_reduction <add>, %6, %cst [1] : vector<16x32xf32> to vector<16xf32>
    %8 = vector.shape_cast %7 : vector<16xf32> to vector<16x1xf32>
    %cst_15 = arith.constant 3.200000e+01 : f32
    %9 = vector.broadcast %cst_15 : f32 to vector<16x1xf32>
    %10 = arith.divf %8, %9 : vector<16x1xf32>
    %cst_16 = arith.constant 9.99999997E-7 : f32
    %11 = vector.broadcast %cst_16 : f32 to vector<16x1xf32>
    %12 = arith.addf %10, %11 : vector<16x1xf32>
    %13 = math.rsqrt %12 : vector<16x1xf32>
    %14 = vector.broadcast %13 : vector<16x1xf32> to vector<16x32xf32>
    %15 = arith.mulf %4, %14 : vector<16x32xf32>
    %16 = vector.broadcast %5 : vector<1x32xf32> to vector<16x32xf32>
    %17 = arith.mulf %15, %16 : vector<16x32xf32>
    %c0_17 = arith.constant 0 : index
    %c0_18 = arith.constant 0 : index
    %18 = vector.load %arg9[%c0_17, %c0_18] : memref<32x96xf32, #tpu.memory_space<vmem>>, vector<32x96xf32>
    %cst_19 = arith.constant dense<0.000000e+00> : vector<16x96xf32>
    %19 = tpu.matmul %17, %18, %cst_19 {dimension_numbers = #tpu.dot_dimension_numbers<[1], [0], [0], [1], [0, 0, 1, 1], [], []>} : vector<16x32xf32>, vector<32x96xf32>, vector<16x96xf32> -> vector<16x96xf32>
    %c0_20 = arith.constant 0 : index
    %c0_21 = arith.constant 0 : index
    %20 = vector.load %arg10[%c0_20, %c0_21] : memref<32x32xf32, #tpu.memory_space<vmem>>, vector<32x32xf32>
    %21 = vector.extract_strided_slice %2 {offsets = [0, 0, 0], sizes = [1, 1, 8], strides = [1, 1, 1]} : vector<2x1x8xf32> to vector<1x1x8xf32>
    %22 = vector.shape_cast %21 : vector<1x1x8xf32> to vector<1x8xf32>
    %23 = vector.shape_cast %22 : vector<1x8xf32> to vector<1x1x8xf32>
    %24 = vector.broadcast %23 : vector<1x1x8xf32> to vector<2x8x8xf32>
    %25 = arith.addf %0, %24 : vector<2x8x8xf32>
    %26 = vector.extract_strided_slice %19 {offsets = [0, 0], sizes = [8, 32], strides = [1, 1]} : vector<16x96xf32> to vector<8x32xf32>
    %27 = vector.extract_strided_slice %19 {offsets = [0, 32], sizes = [8, 32], strides = [1, 1]} : vector<16x96xf32> to vector<8x32xf32>
    %28 = vector.extract_strided_slice %19 {offsets = [0, 64], sizes = [8, 32], strides = [1, 1]} : vector<16x96xf32> to vector<8x32xf32>
    %29 = vector.extract_strided_slice %26 {offsets = [0, 0], sizes = [8, 16], strides = [1, 1]} : vector<8x32xf32> to vector<8x16xf32>
    %30 = vector.extract_strided_slice %27 {offsets = [0, 0], sizes = [8, 16], strides = [1, 1]} : vector<8x32xf32> to vector<8x16xf32>
    %cst_22 = arith.constant dense<0.000000e+00> : vector<8x8xf32>
    %31 = tpu.matmul %29, %30, %cst_22 {dimension_numbers = #tpu.dot_dimension_numbers<[1], [1], [0], [0], [0, 0, 1, 0], [], []>} : vector<8x16xf32>, vector<8x16xf32>, vector<8x8xf32> -> vector<8x8xf32>
    %32 = vector.extract_strided_slice %25 {offsets = [0, 0, 0], sizes = [1, 8, 8], strides = [1, 1, 1]} : vector<2x8x8xf32> to vector<1x8x8xf32>
    %33 = vector.shape_cast %32 : vector<1x8x8xf32> to vector<8x8xf32>
    %34 = arith.addf %31, %33 : vector<8x8xf32>
    %cst_23 = arith.constant dense<0xFF800000> : vector<8xf32>
    %35 = vector.multi_reduction <maximumf>, %34, %cst_23 [1] : vector<8x8xf32> to vector<8xf32>
    %36 = vector.shape_cast %35 : vector<8xf32> to vector<8x1xf32>
    %37 = vector.broadcast %36 : vector<8x1xf32> to vector<8x8xf32>
    %38 = arith.subf %34, %37 : vector<8x8xf32>
    %39 = math.exp %38 : vector<8x8xf32>
    %cst_24 = arith.constant dense<0.000000e+00> : vector<8xf32>
    %40 = vector.multi_reduction <add>, %39, %cst_24 [1] : vector<8x8xf32> to vector<8xf32>
    %41 = vector.shape_cast %40 : vector<8xf32> to vector<8x1xf32>
    %42 = tpu.reciprocal %41 {approx = true} : vector<8x1xf32> -> vector<8x1xf32>
    %43 = vector.broadcast %42 : vector<8x1xf32> to vector<8x8xf32>
    %44 = arith.mulf %39, %43 : vector<8x8xf32>
    %45 = vector.extract_strided_slice %28 {offsets = [0, 0], sizes = [8, 16], strides = [1, 1]} : vector<8x32xf32> to vector<8x16xf32>
    %cst_25 = arith.constant dense<0.000000e+00> : vector<8x16xf32>
    %46 = tpu.matmul %44, %45, %cst_25 {dimension_numbers = #tpu.dot_dimension_numbers<[1], [0], [0], [1], [0, 0, 1, 1], [], []>} : vector<8x8xf32>, vector<8x16xf32>, vector<8x16xf32> -> vector<8x16xf32>
    %47 = vector.extract_strided_slice %26 {offsets = [0, 16], sizes = [8, 16], strides = [1, 1]} : vector<8x32xf32> to vector<8x16xf32>
    %48 = vector.extract_strided_slice %27 {offsets = [0, 16], sizes = [8, 16], strides = [1, 1]} : vector<8x32xf32> to vector<8x16xf32>
    %cst_26 = arith.constant dense<0.000000e+00> : vector<8x8xf32>
    %49 = tpu.matmul %47, %48, %cst_26 {dimension_numbers = #tpu.dot_dimension_numbers<[1], [1], [0], [0], [0, 0, 1, 0], [], []>} : vector<8x16xf32>, vector<8x16xf32>, vector<8x8xf32> -> vector<8x8xf32>
    %50 = vector.extract_strided_slice %25 {offsets = [1, 0, 0], sizes = [1, 8, 8], strides = [1, 1, 1]} : vector<2x8x8xf32> to vector<1x8x8xf32>
    %51 = vector.shape_cast %50 : vector<1x8x8xf32> to vector<8x8xf32>
    %52 = arith.addf %49, %51 : vector<8x8xf32>
    %cst_27 = arith.constant dense<0xFF800000> : vector<8xf32>
    %53 = vector.multi_reduction <maximumf>, %52, %cst_27 [1] : vector<8x8xf32> to vector<8xf32>
    %54 = vector.shape_cast %53 : vector<8xf32> to vector<8x1xf32>
    %55 = vector.broadcast %54 : vector<8x1xf32> to vector<8x8xf32>
    %56 = arith.subf %52, %55 : vector<8x8xf32>
    %57 = math.exp %56 : vector<8x8xf32>
    %cst_28 = arith.constant dense<0.000000e+00> : vector<8xf32>
    %58 = vector.multi_reduction <add>, %57, %cst_28 [1] : vector<8x8xf32> to vector<8xf32>
    %59 = vector.shape_cast %58 : vector<8xf32> to vector<8x1xf32>
    %60 = tpu.reciprocal %59 {approx = true} : vector<8x1xf32> -> vector<8x1xf32>
    %61 = vector.broadcast %60 : vector<8x1xf32> to vector<8x8xf32>
    %62 = arith.mulf %57, %61 : vector<8x8xf32>
    %63 = vector.extract_strided_slice %28 {offsets = [0, 16], sizes = [8, 16], strides = [1, 1]} : vector<8x32xf32> to vector<8x16xf32>
    %cst_29 = arith.constant dense<0.000000e+00> : vector<8x16xf32>
    %64 = tpu.matmul %62, %63, %cst_29 {dimension_numbers = #tpu.dot_dimension_numbers<[1], [0], [0], [1], [0, 0, 1, 1], [], []>} : vector<8x8xf32>, vector<8x16xf32>, vector<8x16xf32> -> vector<8x16xf32>
    %65 = tpu.concatenate %46, %64 in 1 : vector<8x16xf32>, vector<8x16xf32> -> vector<8x32xf32>
    %cst_30 = arith.constant dense<0.000000e+00> : vector<8x32xf32>
    %66 = tpu.matmul %65, %20, %cst_30 {dimension_numbers = #tpu.dot_dimension_numbers<[1], [0], [0], [1], [0, 0, 1, 1], [], []>} : vector<8x32xf32>, vector<32x32xf32>, vector<8x32xf32> -> vector<8x32xf32>
    %67 = vector.extract_strided_slice %2 {offsets = [1, 0, 0], sizes = [1, 1, 8], strides = [1, 1, 1]} : vector<2x1x8xf32> to vector<1x1x8xf32>
    %68 = vector.shape_cast %67 : vector<1x1x8xf32> to vector<1x8xf32>
    %69 = vector.shape_cast %68 : vector<1x8xf32> to vector<1x1x8xf32>
    %70 = vector.broadcast %69 : vector<1x1x8xf32> to vector<2x8x8xf32>
    %71 = arith.addf %0, %70 : vector<2x8x8xf32>
    %72 = vector.extract_strided_slice %19 {offsets = [8, 0], sizes = [8, 32], strides = [1, 1]} : vector<16x96xf32> to vector<8x32xf32>
    %73 = vector.extract_strided_slice %19 {offsets = [8, 32], sizes = [8, 32], strides = [1, 1]} : vector<16x96xf32> to vector<8x32xf32>
    %74 = vector.extract_strided_slice %19 {offsets = [8, 64], sizes = [8, 32], strides = [1, 1]} : vector<16x96xf32> to vector<8x32xf32>
    %75 = vector.extract_strided_slice %72 {offsets = [0, 0], sizes = [8, 16], strides = [1, 1]} : vector<8x32xf32> to vector<8x16xf32>
    %76 = vector.extract_strided_slice %73 {offsets = [0, 0], sizes = [8, 16], strides = [1, 1]} : vector<8x32xf32> to vector<8x16xf32>
    %cst_31 = arith.constant dense<0.000000e+00> : vector<8x8xf32>
    %77 = tpu.matmul %75, %76, %cst_31 {dimension_numbers = #tpu.dot_dimension_numbers<[1], [1], [0], [0], [0, 0, 1, 0], [], []>} : vector<8x16xf32>, vector<8x16xf32>, vector<8x8xf32> -> vector<8x8xf32>
    %78 = vector.extract_strided_slice %71 {offsets = [0, 0, 0], sizes = [1, 8, 8], strides = [1, 1, 1]} : vector<2x8x8xf32> to vector<1x8x8xf32>
    %79 = vector.shape_cast %78 : vector<1x8x8xf32> to vector<8x8xf32>
    %80 = arith.addf %77, %79 : vector<8x8xf32>
    %cst_32 = arith.constant dense<0xFF800000> : vector<8xf32>
    %81 = vector.multi_reduction <maximumf>, %80, %cst_32 [1] : vector<8x8xf32> to vector<8xf32>
    %82 = vector.shape_cast %81 : vector<8xf32> to vector<8x1xf32>
    %83 = vector.broadcast %82 : vector<8x1xf32> to vector<8x8xf32>
    %84 = arith.subf %80, %83 : vector<8x8xf32>
    %85 = math.exp %84 : vector<8x8xf32>
    %cst_33 = arith.constant dense<0.000000e+00> : vector<8xf32>
    %86 = vector.multi_reduction <add>, %85, %cst_33 [1] : vector<8x8xf32> to vector<8xf32>
    %87 = vector.shape_cast %86 : vector<8xf32> to vector<8x1xf32>
    %88 = tpu.reciprocal %87 {approx = true} : vector<8x1xf32> -> vector<8x1xf32>
    %89 = vector.broadcast %88 : vector<8x1xf32> to vector<8x8xf32>
    %90 = arith.mulf %85, %89 : vector<8x8xf32>
    %91 = vector.extract_strided_slice %74 {offsets = [0, 0], sizes = [8, 16], strides = [1, 1]} : vector<8x32xf32> to vector<8x16xf32>
    %cst_34 = arith.constant dense<0.000000e+00> : vector<8x16xf32>
    %92 = tpu.matmul %90, %91, %cst_34 {dimension_numbers = #tpu.dot_dimension_numbers<[1], [0], [0], [1], [0, 0, 1, 1], [], []>} : vector<8x8xf32>, vector<8x16xf32>, vector<8x16xf32> -> vector<8x16xf32>
    %93 = vector.extract_strided_slice %72 {offsets = [0, 16], sizes = [8, 16], strides = [1, 1]} : vector<8x32xf32> to vector<8x16xf32>
    %94 = vector.extract_strided_slice %73 {offsets = [0, 16], sizes = [8, 16], strides = [1, 1]} : vector<8x32xf32> to vector<8x16xf32>
    %cst_35 = arith.constant dense<0.000000e+00> : vector<8x8xf32>
    %95 = tpu.matmul %93, %94, %cst_35 {dimension_numbers = #tpu.dot_dimension_numbers<[1], [1], [0], [0], [0, 0, 1, 0], [], []>} : vector<8x16xf32>, vector<8x16xf32>, vector<8x8xf32> -> vector<8x8xf32>
    %96 = vector.extract_strided_slice %71 {offsets = [1, 0, 0], sizes = [1, 8, 8], strides = [1, 1, 1]} : vector<2x8x8xf32> to vector<1x8x8xf32>
    %97 = vector.shape_cast %96 : vector<1x8x8xf32> to vector<8x8xf32>
    %98 = arith.addf %95, %97 : vector<8x8xf32>
    %cst_36 = arith.constant dense<0xFF800000> : vector<8xf32>
    %99 = vector.multi_reduction <maximumf>, %98, %cst_36 [1] : vector<8x8xf32> to vector<8xf32>
    %100 = vector.shape_cast %99 : vector<8xf32> to vector<8x1xf32>
    %101 = vector.broadcast %100 : vector<8x1xf32> to vector<8x8xf32>
    %102 = arith.subf %98, %101 : vector<8x8xf32>
    %103 = math.exp %102 : vector<8x8xf32>
    %cst_37 = arith.constant dense<0.000000e+00> : vector<8xf32>
    %104 = vector.multi_reduction <add>, %103, %cst_37 [1] : vector<8x8xf32> to vector<8xf32>
    %105 = vector.shape_cast %104 : vector<8xf32> to vector<8x1xf32>
    %106 = tpu.reciprocal %105 {approx = true} : vector<8x1xf32> -> vector<8x1xf32>
    %107 = vector.broadcast %106 : vector<8x1xf32> to vector<8x8xf32>
    %108 = arith.mulf %103, %107 : vector<8x8xf32>
    %109 = vector.extract_strided_slice %74 {offsets = [0, 16], sizes = [8, 16], strides = [1, 1]} : vector<8x32xf32> to vector<8x16xf32>
    %cst_38 = arith.constant dense<0.000000e+00> : vector<8x16xf32>
    %110 = tpu.matmul %108, %109, %cst_38 {dimension_numbers = #tpu.dot_dimension_numbers<[1], [0], [0], [1], [0, 0, 1, 1], [], []>} : vector<8x8xf32>, vector<8x16xf32>, vector<8x16xf32> -> vector<8x16xf32>
    %111 = tpu.concatenate %92, %110 in 1 : vector<8x16xf32>, vector<8x16xf32> -> vector<8x32xf32>
    %cst_39 = arith.constant dense<0.000000e+00> : vector<8x32xf32>
    %112 = tpu.matmul %111, %20, %cst_39 {dimension_numbers = #tpu.dot_dimension_numbers<[1], [0], [0], [1], [0, 0, 1, 1], [], []>} : vector<8x32xf32>, vector<32x32xf32>, vector<8x32xf32> -> vector<8x32xf32>
    %113 = tpu.concatenate %66, %112 in 0 : vector<8x32xf32>, vector<8x32xf32> -> vector<16x32xf32>
    %114 = arith.addf %4, %113 : vector<16x32xf32>
    %c0_40 = arith.constant 0 : index
    %c0_41 = arith.constant 0 : index
    %115 = vector.load %arg11[%c0_40, %c0_41] : memref<1x32xf32, #tpu.memory_space<vmem>>, vector<1x32xf32>
    %116 = arith.mulf %114, %114 : vector<16x32xf32>
    %cst_42 = arith.constant dense<0.000000e+00> : vector<16xf32>
    %117 = vector.multi_reduction <add>, %116, %cst_42 [1] : vector<16x32xf32> to vector<16xf32>
    %118 = vector.shape_cast %117 : vector<16xf32> to vector<16x1xf32>
    %cst_43 = arith.constant 3.200000e+01 : f32
    %119 = vector.broadcast %cst_43 : f32 to vector<16x1xf32>
    %120 = arith.divf %118, %119 : vector<16x1xf32>
    %cst_44 = arith.constant 9.99999997E-7 : f32
    %121 = vector.broadcast %cst_44 : f32 to vector<16x1xf32>
    %122 = arith.addf %120, %121 : vector<16x1xf32>
    %123 = math.rsqrt %122 : vector<16x1xf32>
    %124 = vector.broadcast %123 : vector<16x1xf32> to vector<16x32xf32>
    %125 = arith.mulf %114, %124 : vector<16x32xf32>
    %126 = vector.broadcast %115 : vector<1x32xf32> to vector<16x32xf32>
    %127 = arith.mulf %125, %126 : vector<16x32xf32>
    %c0_45 = arith.constant 0 : index
    %c0_46 = arith.constant 0 : index
    %128 = vector.load %arg12[%c0_45, %c0_46] : memref<32x64xf32, #tpu.memory_space<vmem>>, vector<32x64xf32>
    %cst_47 = arith.constant dense<0.000000e+00> : vector<16x64xf32>
    %129 = tpu.matmul %127, %128, %cst_47 {dimension_numbers = #tpu.dot_dimension_numbers<[1], [0], [0], [1], [0, 0, 1, 1], [], []>} : vector<16x32xf32>, vector<32x64xf32>, vector<16x64xf32> -> vector<16x64xf32>
    %cst_48 = arith.constant 0.000000e+00 : f32
    %130 = vector.broadcast %cst_48 : f32 to vector<16x64xf32>
    %131 = arith.maximumf %129, %130 : vector<16x64xf32>
    %c0_49 = arith.constant 0 : index
    %c0_50 = arith.constant 0 : index
    %132 = vector.load %arg13[%c0_49, %c0_50] : memref<64x32xf32, #tpu.memory_space<vmem>>, vector<64x32xf32>
    %cst_51 = arith.constant dense<0.000000e+00> : vector<16x32xf32>
    %133 = tpu.matmul %131, %132, %cst_51 {dimension_numbers = #tpu.dot_dimension_numbers<[1], [0], [0], [1], [0, 0, 1, 1], [], []>} : vector<16x64xf32>, vector<64x32xf32>, vector<16x32xf32> -> vector<16x32xf32>
    %134 = arith.addf %114, %133 : vector<16x32xf32>
    %c0_52 = arith.constant 0 : index
    %c0_53 = arith.constant 0 : index
    %135 = vector.load %arg14[%c0_52, %c0_53] : memref<1x32xf32, #tpu.memory_space<vmem>>, vector<1x32xf32>
    %136 = arith.mulf %134, %134 : vector<16x32xf32>
    %cst_54 = arith.constant dense<0.000000e+00> : vector<16xf32>
    %137 = vector.multi_reduction <add>, %136, %cst_54 [1] : vector<16x32xf32> to vector<16xf32>
    %138 = vector.shape_cast %137 : vector<16xf32> to vector<16x1xf32>
    %cst_55 = arith.constant 3.200000e+01 : f32
    %139 = vector.broadcast %cst_55 : f32 to vector<16x1xf32>
    %140 = arith.divf %138, %139 : vector<16x1xf32>
    %cst_56 = arith.constant 9.99999997E-7 : f32
    %141 = vector.broadcast %cst_56 : f32 to vector<16x1xf32>
    %142 = arith.addf %140, %141 : vector<16x1xf32>
    %143 = math.rsqrt %142 : vector<16x1xf32>
    %144 = vector.broadcast %143 : vector<16x1xf32> to vector<16x32xf32>
    %145 = arith.mulf %134, %144 : vector<16x32xf32>
    %146 = vector.broadcast %135 : vector<1x32xf32> to vector<16x32xf32>
    %147 = arith.mulf %145, %146 : vector<16x32xf32>
    %c0_57 = arith.constant 0 : index
    %c0_58 = arith.constant 0 : index
    %148 = vector.load %arg2[%c0_57, %c0_58] : memref<16x32xf32, #tpu.memory_space<vmem>>, vector<16x32xf32>
    %c0_59 = arith.constant 0 : index
    %c0_60 = arith.constant 0 : index
    %149 = vector.load %arg15[%c0_59, %c0_60] : memref<1x32xf32, #tpu.memory_space<vmem>>, vector<1x32xf32>
    %150 = arith.mulf %148, %148 : vector<16x32xf32>
    %cst_61 = arith.constant dense<0.000000e+00> : vector<16xf32>
    %151 = vector.multi_reduction <add>, %150, %cst_61 [1] : vector<16x32xf32> to vector<16xf32>
    %152 = vector.shape_cast %151 : vector<16xf32> to vector<16x1xf32>
    %cst_62 = arith.constant 3.200000e+01 : f32
    %153 = vector.broadcast %cst_62 : f32 to vector<16x1xf32>
    %154 = arith.divf %152, %153 : vector<16x1xf32>
    %cst_63 = arith.constant 9.99999997E-7 : f32
    %155 = vector.broadcast %cst_63 : f32 to vector<16x1xf32>
    %156 = arith.addf %154, %155 : vector<16x1xf32>
    %157 = math.rsqrt %156 : vector<16x1xf32>
    %158 = vector.broadcast %157 : vector<16x1xf32> to vector<16x32xf32>
    %159 = arith.mulf %148, %158 : vector<16x32xf32>
    %160 = vector.broadcast %149 : vector<1x32xf32> to vector<16x32xf32>
    %161 = arith.mulf %159, %160 : vector<16x32xf32>
    %c0_64 = arith.constant 0 : index
    %c0_65 = arith.constant 0 : index
    %162 = vector.load %arg16[%c0_64, %c0_65] : memref<32x96xf32, #tpu.memory_space<vmem>>, vector<32x96xf32>
    %cst_66 = arith.constant dense<0.000000e+00> : vector<16x96xf32>
    %163 = tpu.matmul %161, %162, %cst_66 {dimension_numbers = #tpu.dot_dimension_numbers<[1], [0], [0], [1], [0, 0, 1, 1], [], []>} : vector<16x32xf32>, vector<32x96xf32>, vector<16x96xf32> -> vector<16x96xf32>
    %c0_67 = arith.constant 0 : index
    %c0_68 = arith.constant 0 : index
    %164 = vector.load %arg17[%c0_67, %c0_68] : memref<32x32xf32, #tpu.memory_space<vmem>>, vector<32x32xf32>
    %165 = vector.extract_strided_slice %3 {offsets = [0, 0, 0], sizes = [1, 8, 8], strides = [1, 1, 1]} : vector<2x8x8xf32> to vector<1x8x8xf32>
    %166 = vector.shape_cast %165 : vector<1x8x8xf32> to vector<8x8xf32>
    %167 = vector.shape_cast %166 : vector<8x8xf32> to vector<1x8x8xf32>
    %168 = vector.broadcast %167 : vector<1x8x8xf32> to vector<2x8x8xf32>
    %169 = arith.addf %1, %168 : vector<2x8x8xf32>
    %170 = vector.extract_strided_slice %163 {offsets = [0, 0], sizes = [8, 32], strides = [1, 1]} : vector<16x96xf32> to vector<8x32xf32>
    %171 = vector.extract_strided_slice %163 {offsets = [0, 32], sizes = [8, 32], strides = [1, 1]} : vector<16x96xf32> to vector<8x32xf32>
    %172 = vector.extract_strided_slice %163 {offsets = [0, 64], sizes = [8, 32], strides = [1, 1]} : vector<16x96xf32> to vector<8x32xf32>
    %173 = vector.extract_strided_slice %170 {offsets = [0, 0], sizes = [8, 16], strides = [1, 1]} : vector<8x32xf32> to vector<8x16xf32>
    %174 = vector.extract_strided_slice %171 {offsets = [0, 0], sizes = [8, 16], strides = [1, 1]} : vector<8x32xf32> to vector<8x16xf32>
    %cst_69 = arith.constant dense<0.000000e+00> : vector<8x8xf32>
    %175 = tpu.matmul %173, %174, %cst_69 {dimension_numbers = #tpu.dot_dimension_numbers<[1], [1], [0], [0], [0, 0, 1, 0], [], []>} : vector<8x16xf32>, vector<8x16xf32>, vector<8x8xf32> -> vector<8x8xf32>
    %176 = vector.extract_strided_slice %169 {offsets = [0, 0, 0], sizes = [1, 8, 8], strides = [1, 1, 1]} : vector<2x8x8xf32> to vector<1x8x8xf32>
    %177 = vector.shape_cast %176 : vector<1x8x8xf32> to vector<8x8xf32>
    %178 = arith.addf %175, %177 : vector<8x8xf32>
    %cst_70 = arith.constant dense<0xFF800000> : vector<8xf32>
    %179 = vector.multi_reduction <maximumf>, %178, %cst_70 [1] : vector<8x8xf32> to vector<8xf32>
    %180 = vector.shape_cast %179 : vector<8xf32> to vector<8x1xf32>
    %181 = vector.broadcast %180 : vector<8x1xf32> to vector<8x8xf32>
    %182 = arith.subf %178, %181 : vector<8x8xf32>
    %183 = math.exp %182 : vector<8x8xf32>
    %cst_71 = arith.constant dense<0.000000e+00> : vector<8xf32>
    %184 = vector.multi_reduction <add>, %183, %cst_71 [1] : vector<8x8xf32> to vector<8xf32>
    %185 = vector.shape_cast %184 : vector<8xf32> to vector<8x1xf32>
    %186 = tpu.reciprocal %185 {approx = true} : vector<8x1xf32> -> vector<8x1xf32>
    %187 = vector.broadcast %186 : vector<8x1xf32> to vector<8x8xf32>
    %188 = arith.mulf %183, %187 : vector<8x8xf32>
    %189 = vector.extract_strided_slice %172 {offsets = [0, 0], sizes = [8, 16], strides = [1, 1]} : vector<8x32xf32> to vector<8x16xf32>
    %cst_72 = arith.constant dense<0.000000e+00> : vector<8x16xf32>
    %190 = tpu.matmul %188, %189, %cst_72 {dimension_numbers = #tpu.dot_dimension_numbers<[1], [0], [0], [1], [0, 0, 1, 1], [], []>} : vector<8x8xf32>, vector<8x16xf32>, vector<8x16xf32> -> vector<8x16xf32>
    %191 = vector.extract_strided_slice %170 {offsets = [0, 16], sizes = [8, 16], strides = [1, 1]} : vector<8x32xf32> to vector<8x16xf32>
    %192 = vector.extract_strided_slice %171 {offsets = [0, 16], sizes = [8, 16], strides = [1, 1]} : vector<8x32xf32> to vector<8x16xf32>
    %cst_73 = arith.constant dense<0.000000e+00> : vector<8x8xf32>
    %193 = tpu.matmul %191, %192, %cst_73 {dimension_numbers = #tpu.dot_dimension_numbers<[1], [1], [0], [0], [0, 0, 1, 0], [], []>} : vector<8x16xf32>, vector<8x16xf32>, vector<8x8xf32> -> vector<8x8xf32>
    %194 = vector.extract_strided_slice %169 {offsets = [1, 0, 0], sizes = [1, 8, 8], strides = [1, 1, 1]} : vector<2x8x8xf32> to vector<1x8x8xf32>
    %195 = vector.shape_cast %194 : vector<1x8x8xf32> to vector<8x8xf32>
    %196 = arith.addf %193, %195 : vector<8x8xf32>
    %cst_74 = arith.constant dense<0xFF800000> : vector<8xf32>
    %197 = vector.multi_reduction <maximumf>, %196, %cst_74 [1] : vector<8x8xf32> to vector<8xf32>
    %198 = vector.shape_cast %197 : vector<8xf32> to vector<8x1xf32>
    %199 = vector.broadcast %198 : vector<8x1xf32> to vector<8x8xf32>
    %200 = arith.subf %196, %199 : vector<8x8xf32>
    %201 = math.exp %200 : vector<8x8xf32>
    %cst_75 = arith.constant dense<0.000000e+00> : vector<8xf32>
    %202 = vector.multi_reduction <add>, %201, %cst_75 [1] : vector<8x8xf32> to vector<8xf32>
    %203 = vector.shape_cast %202 : vector<8xf32> to vector<8x1xf32>
    %204 = tpu.reciprocal %203 {approx = true} : vector<8x1xf32> -> vector<8x1xf32>
    %205 = vector.broadcast %204 : vector<8x1xf32> to vector<8x8xf32>
    %206 = arith.mulf %201, %205 : vector<8x8xf32>
    %207 = vector.extract_strided_slice %172 {offsets = [0, 16], sizes = [8, 16], strides = [1, 1]} : vector<8x32xf32> to vector<8x16xf32>
    %cst_76 = arith.constant dense<0.000000e+00> : vector<8x16xf32>
    %208 = tpu.matmul %206, %207, %cst_76 {dimension_numbers = #tpu.dot_dimension_numbers<[1], [0], [0], [1], [0, 0, 1, 1], [], []>} : vector<8x8xf32>, vector<8x16xf32>, vector<8x16xf32> -> vector<8x16xf32>
    %209 = tpu.concatenate %190, %208 in 1 : vector<8x16xf32>, vector<8x16xf32> -> vector<8x32xf32>
    %cst_77 = arith.constant dense<0.000000e+00> : vector<8x32xf32>
    %210 = tpu.matmul %209, %164, %cst_77 {dimension_numbers = #tpu.dot_dimension_numbers<[1], [0], [0], [1], [0, 0, 1, 1], [], []>} : vector<8x32xf32>, vector<32x32xf32>, vector<8x32xf32> -> vector<8x32xf32>
    %211 = vector.extract_strided_slice %3 {offsets = [1, 0, 0], sizes = [1, 8, 8], strides = [1, 1, 1]} : vector<2x8x8xf32> to vector<1x8x8xf32>
    %212 = vector.shape_cast %211 : vector<1x8x8xf32> to vector<8x8xf32>
    %213 = vector.shape_cast %212 : vector<8x8xf32> to vector<1x8x8xf32>
    %214 = vector.broadcast %213 : vector<1x8x8xf32> to vector<2x8x8xf32>
    %215 = arith.addf %1, %214 : vector<2x8x8xf32>
    %216 = vector.extract_strided_slice %163 {offsets = [8, 0], sizes = [8, 32], strides = [1, 1]} : vector<16x96xf32> to vector<8x32xf32>
    %217 = vector.extract_strided_slice %163 {offsets = [8, 32], sizes = [8, 32], strides = [1, 1]} : vector<16x96xf32> to vector<8x32xf32>
    %218 = vector.extract_strided_slice %163 {offsets = [8, 64], sizes = [8, 32], strides = [1, 1]} : vector<16x96xf32> to vector<8x32xf32>
    %219 = vector.extract_strided_slice %216 {offsets = [0, 0], sizes = [8, 16], strides = [1, 1]} : vector<8x32xf32> to vector<8x16xf32>
    %220 = vector.extract_strided_slice %217 {offsets = [0, 0], sizes = [8, 16], strides = [1, 1]} : vector<8x32xf32> to vector<8x16xf32>
    %cst_78 = arith.constant dense<0.000000e+00> : vector<8x8xf32>
    %221 = tpu.matmul %219, %220, %cst_78 {dimension_numbers = #tpu.dot_dimension_numbers<[1], [1], [0], [0], [0, 0, 1, 0], [], []>} : vector<8x16xf32>, vector<8x16xf32>, vector<8x8xf32> -> vector<8x8xf32>
    %222 = vector.extract_strided_slice %215 {offsets = [0, 0, 0], sizes = [1, 8, 8], strides = [1, 1, 1]} : vector<2x8x8xf32> to vector<1x8x8xf32>
    %223 = vector.shape_cast %222 : vector<1x8x8xf32> to vector<8x8xf32>
    %224 = arith.addf %221, %223 : vector<8x8xf32>
    %cst_79 = arith.constant dense<0xFF800000> : vector<8xf32>
    %225 = vector.multi_reduction <maximumf>, %224, %cst_79 [1] : vector<8x8xf32> to vector<8xf32>
    %226 = vector.shape_cast %225 : vector<8xf32> to vector<8x1xf32>
    %227 = vector.broadcast %226 : vector<8x1xf32> to vector<8x8xf32>
    %228 = arith.subf %224, %227 : vector<8x8xf32>
    %229 = math.exp %228 : vector<8x8xf32>
    %cst_80 = arith.constant dense<0.000000e+00> : vector<8xf32>
    %230 = vector.multi_reduction <add>, %229, %cst_80 [1] : vector<8x8xf32> to vector<8xf32>
    %231 = vector.shape_cast %230 : vector<8xf32> to vector<8x1xf32>
    %232 = tpu.reciprocal %231 {approx = true} : vector<8x1xf32> -> vector<8x1xf32>
    %233 = vector.broadcast %232 : vector<8x1xf32> to vector<8x8xf32>
    %234 = arith.mulf %229, %233 : vector<8x8xf32>
    %235 = vector.extract_strided_slice %218 {offsets = [0, 0], sizes = [8, 16], strides = [1, 1]} : vector<8x32xf32> to vector<8x16xf32>
    %cst_81 = arith.constant dense<0.000000e+00> : vector<8x16xf32>
    %236 = tpu.matmul %234, %235, %cst_81 {dimension_numbers = #tpu.dot_dimension_numbers<[1], [0], [0], [1], [0, 0, 1, 1], [], []>} : vector<8x8xf32>, vector<8x16xf32>, vector<8x16xf32> -> vector<8x16xf32>
    %237 = vector.extract_strided_slice %216 {offsets = [0, 16], sizes = [8, 16], strides = [1, 1]} : vector<8x32xf32> to vector<8x16xf32>
    %238 = vector.extract_strided_slice %217 {offsets = [0, 16], sizes = [8, 16], strides = [1, 1]} : vector<8x32xf32> to vector<8x16xf32>
    %cst_82 = arith.constant dense<0.000000e+00> : vector<8x8xf32>
    %239 = tpu.matmul %237, %238, %cst_82 {dimension_numbers = #tpu.dot_dimension_numbers<[1], [1], [0], [0], [0, 0, 1, 0], [], []>} : vector<8x16xf32>, vector<8x16xf32>, vector<8x8xf32> -> vector<8x8xf32>
    %240 = vector.extract_strided_slice %215 {offsets = [1, 0, 0], sizes = [1, 8, 8], strides = [1, 1, 1]} : vector<2x8x8xf32> to vector<1x8x8xf32>
    %241 = vector.shape_cast %240 : vector<1x8x8xf32> to vector<8x8xf32>
    %242 = arith.addf %239, %241 : vector<8x8xf32>
    %cst_83 = arith.constant dense<0xFF800000> : vector<8xf32>
    %243 = vector.multi_reduction <maximumf>, %242, %cst_83 [1] : vector<8x8xf32> to vector<8xf32>
    %244 = vector.shape_cast %243 : vector<8xf32> to vector<8x1xf32>
    %245 = vector.broadcast %244 : vector<8x1xf32> to vector<8x8xf32>
    %246 = arith.subf %242, %245 : vector<8x8xf32>
    %247 = math.exp %246 : vector<8x8xf32>
    %cst_84 = arith.constant dense<0.000000e+00> : vector<8xf32>
    %248 = vector.multi_reduction <add>, %247, %cst_84 [1] : vector<8x8xf32> to vector<8xf32>
    %249 = vector.shape_cast %248 : vector<8xf32> to vector<8x1xf32>
    %250 = tpu.reciprocal %249 {approx = true} : vector<8x1xf32> -> vector<8x1xf32>
    %251 = vector.broadcast %250 : vector<8x1xf32> to vector<8x8xf32>
    %252 = arith.mulf %247, %251 : vector<8x8xf32>
    %253 = vector.extract_strided_slice %218 {offsets = [0, 16], sizes = [8, 16], strides = [1, 1]} : vector<8x32xf32> to vector<8x16xf32>
    %cst_85 = arith.constant dense<0.000000e+00> : vector<8x16xf32>
    %254 = tpu.matmul %252, %253, %cst_85 {dimension_numbers = #tpu.dot_dimension_numbers<[1], [0], [0], [1], [0, 0, 1, 1], [], []>} : vector<8x8xf32>, vector<8x16xf32>, vector<8x16xf32> -> vector<8x16xf32>
    %255 = tpu.concatenate %236, %254 in 1 : vector<8x16xf32>, vector<8x16xf32> -> vector<8x32xf32>
    %cst_86 = arith.constant dense<0.000000e+00> : vector<8x32xf32>
    %256 = tpu.matmul %255, %164, %cst_86 {dimension_numbers = #tpu.dot_dimension_numbers<[1], [0], [0], [1], [0, 0, 1, 1], [], []>} : vector<8x32xf32>, vector<32x32xf32>, vector<8x32xf32> -> vector<8x32xf32>
    %257 = tpu.concatenate %210, %256 in 0 : vector<8x32xf32>, vector<8x32xf32> -> vector<16x32xf32>
    %258 = arith.addf %148, %257 : vector<16x32xf32>
    %c0_87 = arith.constant 0 : index
    %c0_88 = arith.constant 0 : index
    %259 = vector.load %arg18[%c0_87, %c0_88] : memref<1x32xf32, #tpu.memory_space<vmem>>, vector<1x32xf32>
    %260 = arith.mulf %258, %258 : vector<16x32xf32>
    %cst_89 = arith.constant dense<0.000000e+00> : vector<16xf32>
    %261 = vector.multi_reduction <add>, %260, %cst_89 [1] : vector<16x32xf32> to vector<16xf32>
    %262 = vector.shape_cast %261 : vector<16xf32> to vector<16x1xf32>
    %cst_90 = arith.constant 3.200000e+01 : f32
    %263 = vector.broadcast %cst_90 : f32 to vector<16x1xf32>
    %264 = arith.divf %262, %263 : vector<16x1xf32>
    %cst_91 = arith.constant 9.99999997E-7 : f32
    %265 = vector.broadcast %cst_91 : f32 to vector<16x1xf32>
    %266 = arith.addf %264, %265 : vector<16x1xf32>
    %267 = math.rsqrt %266 : vector<16x1xf32>
    %268 = vector.broadcast %267 : vector<16x1xf32> to vector<16x32xf32>
    %269 = arith.mulf %258, %268 : vector<16x32xf32>
    %270 = vector.broadcast %259 : vector<1x32xf32> to vector<16x32xf32>
    %271 = arith.mulf %269, %270 : vector<16x32xf32>
    %c0_92 = arith.constant 0 : index
    %c0_93 = arith.constant 0 : index
    %272 = vector.load %arg19[%c0_92, %c0_93] : memref<32x32xf32, #tpu.memory_space<vmem>>, vector<32x32xf32>
    %cst_94 = arith.constant dense<0.000000e+00> : vector<16x32xf32>
    %273 = tpu.matmul %271, %272, %cst_94 {dimension_numbers = #tpu.dot_dimension_numbers<[1], [0], [0], [1], [0, 0, 1, 1], [], []>} : vector<16x32xf32>, vector<32x32xf32>, vector<16x32xf32> -> vector<16x32xf32>
    %c0_95 = arith.constant 0 : index
    %c0_96 = arith.constant 0 : index
    %274 = vector.load %arg20[%c0_95, %c0_96] : memref<32x64xf32, #tpu.memory_space<vmem>>, vector<32x64xf32>
    %cst_97 = arith.constant dense<0.000000e+00> : vector<16x64xf32>
    %275 = tpu.matmul %147, %274, %cst_97 {dimension_numbers = #tpu.dot_dimension_numbers<[1], [0], [0], [1], [0, 0, 1, 1], [], []>} : vector<16x32xf32>, vector<32x64xf32>, vector<16x64xf32> -> vector<16x64xf32>
    %c0_98 = arith.constant 0 : index
    %c0_99 = arith.constant 0 : index
    %276 = vector.load %arg21[%c0_98, %c0_99] : memref<32x32xf32, #tpu.memory_space<vmem>>, vector<32x32xf32>
    %277 = vector.extract_strided_slice %273 {offsets = [0, 0], sizes = [8, 32], strides = [1, 1]} : vector<16x32xf32> to vector<8x32xf32>
    %278 = vector.extract_strided_slice %275 {offsets = [0, 0], sizes = [8, 32], strides = [1, 1]} : vector<16x64xf32> to vector<8x32xf32>
    %279 = vector.extract_strided_slice %275 {offsets = [0, 32], sizes = [8, 32], strides = [1, 1]} : vector<16x64xf32> to vector<8x32xf32>
    %280 = vector.extract_strided_slice %2 {offsets = [0, 0, 0], sizes = [1, 1, 8], strides = [1, 1, 1]} : vector<2x1x8xf32> to vector<1x1x8xf32>
    %281 = vector.shape_cast %280 : vector<1x1x8xf32> to vector<1x8xf32>
    %282 = vector.extract_strided_slice %277 {offsets = [0, 0], sizes = [8, 16], strides = [1, 1]} : vector<8x32xf32> to vector<8x16xf32>
    %283 = vector.extract_strided_slice %278 {offsets = [0, 0], sizes = [8, 16], strides = [1, 1]} : vector<8x32xf32> to vector<8x16xf32>
    %cst_100 = arith.constant dense<0.000000e+00> : vector<8x8xf32>
    %284 = tpu.matmul %282, %283, %cst_100 {dimension_numbers = #tpu.dot_dimension_numbers<[1], [1], [0], [0], [0, 0, 1, 0], [], []>} : vector<8x16xf32>, vector<8x16xf32>, vector<8x8xf32> -> vector<8x8xf32>
    %285 = vector.broadcast %281 : vector<1x8xf32> to vector<8x8xf32>
    %286 = arith.addf %284, %285 : vector<8x8xf32>
    %cst_101 = arith.constant dense<0xFF800000> : vector<8xf32>
    %287 = vector.multi_reduction <maximumf>, %286, %cst_101 [1] : vector<8x8xf32> to vector<8xf32>
    %288 = vector.shape_cast %287 : vector<8xf32> to vector<8x1xf32>
    %289 = vector.broadcast %288 : vector<8x1xf32> to vector<8x8xf32>
    %290 = arith.subf %286, %289 : vector<8x8xf32>
    %291 = math.exp %290 : vector<8x8xf32>
    %cst_102 = arith.constant dense<0.000000e+00> : vector<8xf32>
    %292 = vector.multi_reduction <add>, %291, %cst_102 [1] : vector<8x8xf32> to vector<8xf32>
    %293 = vector.shape_cast %292 : vector<8xf32> to vector<8x1xf32>
    %294 = tpu.reciprocal %293 {approx = true} : vector<8x1xf32> -> vector<8x1xf32>
    %295 = vector.broadcast %294 : vector<8x1xf32> to vector<8x8xf32>
    %296 = arith.mulf %291, %295 : vector<8x8xf32>
    %297 = vector.extract_strided_slice %279 {offsets = [0, 0], sizes = [8, 16], strides = [1, 1]} : vector<8x32xf32> to vector<8x16xf32>
    %cst_103 = arith.constant dense<0.000000e+00> : vector<8x16xf32>
    %298 = tpu.matmul %296, %297, %cst_103 {dimension_numbers = #tpu.dot_dimension_numbers<[1], [0], [0], [1], [0, 0, 1, 1], [], []>} : vector<8x8xf32>, vector<8x16xf32>, vector<8x16xf32> -> vector<8x16xf32>
    %299 = vector.extract_strided_slice %277 {offsets = [0, 16], sizes = [8, 16], strides = [1, 1]} : vector<8x32xf32> to vector<8x16xf32>
    %300 = vector.extract_strided_slice %278 {offsets = [0, 16], sizes = [8, 16], strides = [1, 1]} : vector<8x32xf32> to vector<8x16xf32>
    %cst_104 = arith.constant dense<0.000000e+00> : vector<8x8xf32>
    %301 = tpu.matmul %299, %300, %cst_104 {dimension_numbers = #tpu.dot_dimension_numbers<[1], [1], [0], [0], [0, 0, 1, 0], [], []>} : vector<8x16xf32>, vector<8x16xf32>, vector<8x8xf32> -> vector<8x8xf32>
    %302 = vector.broadcast %281 : vector<1x8xf32> to vector<8x8xf32>
    %303 = arith.addf %301, %302 : vector<8x8xf32>
    %cst_105 = arith.constant dense<0xFF800000> : vector<8xf32>
    %304 = vector.multi_reduction <maximumf>, %303, %cst_105 [1] : vector<8x8xf32> to vector<8xf32>
    %305 = vector.shape_cast %304 : vector<8xf32> to vector<8x1xf32>
    %306 = vector.broadcast %305 : vector<8x1xf32> to vector<8x8xf32>
    %307 = arith.subf %303, %306 : vector<8x8xf32>
    %308 = math.exp %307 : vector<8x8xf32>
    %cst_106 = arith.constant dense<0.000000e+00> : vector<8xf32>
    %309 = vector.multi_reduction <add>, %308, %cst_106 [1] : vector<8x8xf32> to vector<8xf32>
    %310 = vector.shape_cast %309 : vector<8xf32> to vector<8x1xf32>
    %311 = tpu.reciprocal %310 {approx = true} : vector<8x1xf32> -> vector<8x1xf32>
    %312 = vector.broadcast %311 : vector<8x1xf32> to vector<8x8xf32>
    %313 = arith.mulf %308, %312 : vector<8x8xf32>
    %314 = vector.extract_strided_slice %279 {offsets = [0, 16], sizes = [8, 16], strides = [1, 1]} : vector<8x32xf32> to vector<8x16xf32>
    %cst_107 = arith.constant dense<0.000000e+00> : vector<8x16xf32>
    %315 = tpu.matmul %313, %314, %cst_107 {dimension_numbers = #tpu.dot_dimension_numbers<[1], [0], [0], [1], [0, 0, 1, 1], [], []>} : vector<8x8xf32>, vector<8x16xf32>, vector<8x16xf32> -> vector<8x16xf32>
    %316 = tpu.concatenate %298, %315 in 1 : vector<8x16xf32>, vector<8x16xf32> -> vector<8x32xf32>
    %cst_108 = arith.constant dense<0.000000e+00> : vector<8x32xf32>
    %317 = tpu.matmul %316, %276, %cst_108 {dimension_numbers = #tpu.dot_dimension_numbers<[1], [0], [0], [1], [0, 0, 1, 1], [], []>} : vector<8x32xf32>, vector<32x32xf32>, vector<8x32xf32> -> vector<8x32xf32>
    %318 = vector.extract_strided_slice %273 {offsets = [8, 0], sizes = [8, 32], strides = [1, 1]} : vector<16x32xf32> to vector<8x32xf32>
    %319 = vector.extract_strided_slice %275 {offsets = [8, 0], sizes = [8, 32], strides = [1, 1]} : vector<16x64xf32> to vector<8x32xf32>
    %320 = vector.extract_strided_slice %275 {offsets = [8, 32], sizes = [8, 32], strides = [1, 1]} : vector<16x64xf32> to vector<8x32xf32>
    %321 = vector.extract_strided_slice %2 {offsets = [1, 0, 0], sizes = [1, 1, 8], strides = [1, 1, 1]} : vector<2x1x8xf32> to vector<1x1x8xf32>
    %322 = vector.shape_cast %321 : vector<1x1x8xf32> to vector<1x8xf32>
    %323 = vector.extract_strided_slice %318 {offsets = [0, 0], sizes = [8, 16], strides = [1, 1]} : vector<8x32xf32> to vector<8x16xf32>
    %324 = vector.extract_strided_slice %319 {offsets = [0, 0], sizes = [8, 16], strides = [1, 1]} : vector<8x32xf32> to vector<8x16xf32>
    %cst_109 = arith.constant dense<0.000000e+00> : vector<8x8xf32>
    %325 = tpu.matmul %323, %324, %cst_109 {dimension_numbers = #tpu.dot_dimension_numbers<[1], [1], [0], [0], [0, 0, 1, 0], [], []>} : vector<8x16xf32>, vector<8x16xf32>, vector<8x8xf32> -> vector<8x8xf32>
    %326 = vector.broadcast %322 : vector<1x8xf32> to vector<8x8xf32>
    %327 = arith.addf %325, %326 : vector<8x8xf32>
    %cst_110 = arith.constant dense<0xFF800000> : vector<8xf32>
    %328 = vector.multi_reduction <maximumf>, %327, %cst_110 [1] : vector<8x8xf32> to vector<8xf32>
    %329 = vector.shape_cast %328 : vector<8xf32> to vector<8x1xf32>
    %330 = vector.broadcast %329 : vector<8x1xf32> to vector<8x8xf32>
    %331 = arith.subf %327, %330 : vector<8x8xf32>
    %332 = math.exp %331 : vector<8x8xf32>
    %cst_111 = arith.constant dense<0.000000e+00> : vector<8xf32>
    %333 = vector.multi_reduction <add>, %332, %cst_111 [1] : vector<8x8xf32> to vector<8xf32>
    %334 = vector.shape_cast %333 : vector<8xf32> to vector<8x1xf32>
    %335 = tpu.reciprocal %334 {approx = true} : vector<8x1xf32> -> vector<8x1xf32>
    %336 = vector.broadcast %335 : vector<8x1xf32> to vector<8x8xf32>
    %337 = arith.mulf %332, %336 : vector<8x8xf32>
    %338 = vector.extract_strided_slice %320 {offsets = [0, 0], sizes = [8, 16], strides = [1, 1]} : vector<8x32xf32> to vector<8x16xf32>
    %cst_112 = arith.constant dense<0.000000e+00> : vector<8x16xf32>
    %339 = tpu.matmul %337, %338, %cst_112 {dimension_numbers = #tpu.dot_dimension_numbers<[1], [0], [0], [1], [0, 0, 1, 1], [], []>} : vector<8x8xf32>, vector<8x16xf32>, vector<8x16xf32> -> vector<8x16xf32>
    %340 = vector.extract_strided_slice %318 {offsets = [0, 16], sizes = [8, 16], strides = [1, 1]} : vector<8x32xf32> to vector<8x16xf32>
    %341 = vector.extract_strided_slice %319 {offsets = [0, 16], sizes = [8, 16], strides = [1, 1]} : vector<8x32xf32> to vector<8x16xf32>
    %cst_113 = arith.constant dense<0.000000e+00> : vector<8x8xf32>
    %342 = tpu.matmul %340, %341, %cst_113 {dimension_numbers = #tpu.dot_dimension_numbers<[1], [1], [0], [0], [0, 0, 1, 0], [], []>} : vector<8x16xf32>, vector<8x16xf32>, vector<8x8xf32> -> vector<8x8xf32>
    %343 = vector.broadcast %322 : vector<1x8xf32> to vector<8x8xf32>
    %344 = arith.addf %342, %343 : vector<8x8xf32>
    %cst_114 = arith.constant dense<0xFF800000> : vector<8xf32>
    %345 = vector.multi_reduction <maximumf>, %344, %cst_114 [1] : vector<8x8xf32> to vector<8xf32>
    %346 = vector.shape_cast %345 : vector<8xf32> to vector<8x1xf32>
    %347 = vector.broadcast %346 : vector<8x1xf32> to vector<8x8xf32>
    %348 = arith.subf %344, %347 : vector<8x8xf32>
    %349 = math.exp %348 : vector<8x8xf32>
    %cst_115 = arith.constant dense<0.000000e+00> : vector<8xf32>
    %350 = vector.multi_reduction <add>, %349, %cst_115 [1] : vector<8x8xf32> to vector<8xf32>
    %351 = vector.shape_cast %350 : vector<8xf32> to vector<8x1xf32>
    %352 = tpu.reciprocal %351 {approx = true} : vector<8x1xf32> -> vector<8x1xf32>
    %353 = vector.broadcast %352 : vector<8x1xf32> to vector<8x8xf32>
    %354 = arith.mulf %349, %353 : vector<8x8xf32>
    %355 = vector.extract_strided_slice %320 {offsets = [0, 16], sizes = [8, 16], strides = [1, 1]} : vector<8x32xf32> to vector<8x16xf32>
    %cst_116 = arith.constant dense<0.000000e+00> : vector<8x16xf32>
    %356 = tpu.matmul %354, %355, %cst_116 {dimension_numbers = #tpu.dot_dimension_numbers<[1], [0], [0], [1], [0, 0, 1, 1], [], []>} : vector<8x8xf32>, vector<8x16xf32>, vector<8x16xf32> -> vector<8x16xf32>
    %357 = tpu.concatenate %339, %356 in 1 : vector<8x16xf32>, vector<8x16xf32> -> vector<8x32xf32>
    %cst_117 = arith.constant dense<0.000000e+00> : vector<8x32xf32>
    %358 = tpu.matmul %357, %276, %cst_117 {dimension_numbers = #tpu.dot_dimension_numbers<[1], [0], [0], [1], [0, 0, 1, 1], [], []>} : vector<8x32xf32>, vector<32x32xf32>, vector<8x32xf32> -> vector<8x32xf32>
    %359 = tpu.concatenate %317, %358 in 0 : vector<8x32xf32>, vector<8x32xf32> -> vector<16x32xf32>
    %360 = arith.addf %258, %359 : vector<16x32xf32>
    %c0_118 = arith.constant 0 : index
    %c0_119 = arith.constant 0 : index
    %361 = vector.load %arg22[%c0_118, %c0_119] : memref<1x32xf32, #tpu.memory_space<vmem>>, vector<1x32xf32>
    %362 = arith.mulf %360, %360 : vector<16x32xf32>
    %cst_120 = arith.constant dense<0.000000e+00> : vector<16xf32>
    %363 = vector.multi_reduction <add>, %362, %cst_120 [1] : vector<16x32xf32> to vector<16xf32>
    %364 = vector.shape_cast %363 : vector<16xf32> to vector<16x1xf32>
    %cst_121 = arith.constant 3.200000e+01 : f32
    %365 = vector.broadcast %cst_121 : f32 to vector<16x1xf32>
    %366 = arith.divf %364, %365 : vector<16x1xf32>
    %cst_122 = arith.constant 9.99999997E-7 : f32
    %367 = vector.broadcast %cst_122 : f32 to vector<16x1xf32>
    %368 = arith.addf %366, %367 : vector<16x1xf32>
    %369 = math.rsqrt %368 : vector<16x1xf32>
    %370 = vector.broadcast %369 : vector<16x1xf32> to vector<16x32xf32>
    %371 = arith.mulf %360, %370 : vector<16x32xf32>
    %372 = vector.broadcast %361 : vector<1x32xf32> to vector<16x32xf32>
    %373 = arith.mulf %371, %372 : vector<16x32xf32>
    %c0_123 = arith.constant 0 : index
    %c0_124 = arith.constant 0 : index
    %374 = vector.load %arg23[%c0_123, %c0_124] : memref<32x64xf32, #tpu.memory_space<vmem>>, vector<32x64xf32>
    %cst_125 = arith.constant dense<0.000000e+00> : vector<16x64xf32>
    %375 = tpu.matmul %373, %374, %cst_125 {dimension_numbers = #tpu.dot_dimension_numbers<[1], [0], [0], [1], [0, 0, 1, 1], [], []>} : vector<16x32xf32>, vector<32x64xf32>, vector<16x64xf32> -> vector<16x64xf32>
    %cst_126 = arith.constant 0.000000e+00 : f32
    %376 = vector.broadcast %cst_126 : f32 to vector<16x64xf32>
    %377 = arith.maximumf %375, %376 : vector<16x64xf32>
    %c0_127 = arith.constant 0 : index
    %c0_128 = arith.constant 0 : index
    %378 = vector.load %arg24[%c0_127, %c0_128] : memref<64x32xf32, #tpu.memory_space<vmem>>, vector<64x32xf32>
    %cst_129 = arith.constant dense<0.000000e+00> : vector<16x32xf32>
    %379 = tpu.matmul %377, %378, %cst_129 {dimension_numbers = #tpu.dot_dimension_numbers<[1], [0], [0], [1], [0, 0, 1, 1], [], []>} : vector<16x64xf32>, vector<64x32xf32>, vector<16x32xf32> -> vector<16x32xf32>
    %380 = arith.addf %360, %379 : vector<16x32xf32>
    %c0_130 = arith.constant 0 : index
    %c0_131 = arith.constant 0 : index
    %381 = vector.load %arg25[%c0_130, %c0_131] : memref<1x32xf32, #tpu.memory_space<vmem>>, vector<1x32xf32>
    %382 = arith.mulf %380, %380 : vector<16x32xf32>
    %cst_132 = arith.constant dense<0.000000e+00> : vector<16xf32>
    %383 = vector.multi_reduction <add>, %382, %cst_132 [1] : vector<16x32xf32> to vector<16xf32>
    %384 = vector.shape_cast %383 : vector<16xf32> to vector<16x1xf32>
    %cst_133 = arith.constant 3.200000e+01 : f32
    %385 = vector.broadcast %cst_133 : f32 to vector<16x1xf32>
    %386 = arith.divf %384, %385 : vector<16x1xf32>
    %cst_134 = arith.constant 9.99999997E-7 : f32
    %387 = vector.broadcast %cst_134 : f32 to vector<16x1xf32>
    %388 = arith.addf %386, %387 : vector<16x1xf32>
    %389 = math.rsqrt %388 : vector<16x1xf32>
    %390 = vector.broadcast %389 : vector<16x1xf32> to vector<16x32xf32>
    %391 = arith.mulf %380, %390 : vector<16x32xf32>
    %392 = vector.broadcast %381 : vector<1x32xf32> to vector<16x32xf32>
    %393 = arith.mulf %391, %392 : vector<16x32xf32>
    %cst_135 = arith.constant 0.176776692 : f32
    %394 = vector.broadcast %cst_135 : f32 to vector<16x32xf32>
    %395 = arith.mulf %393, %394 : vector<16x32xf32>
    %c0_136 = arith.constant 0 : index
    %c0_137 = arith.constant 0 : index
    %396 = vector.load %arg26[%c0_136, %c0_137] : memref<64x32xf32, #tpu.memory_space<vmem>>, vector<64x32xf32>
    %cst_138 = arith.constant dense<0.000000e+00> : vector<16x64xf32>
    %397 = tpu.matmul %395, %396, %cst_138 {dimension_numbers = #tpu.dot_dimension_numbers<[1], [1], [0], [0], [0, 0, 1, 0], [], []>} : vector<16x32xf32>, vector<64x32xf32>, vector<16x64xf32> -> vector<16x64xf32>
    %c0_139 = arith.constant 0 : index
    %c0_140 = arith.constant 0 : index
    %398 = vector.load %arg27[%c0_139, %c0_140] : memref<16x64xf32, #tpu.memory_space<vmem>>, vector<16x64xf32>
    tpu.vector_store %arg27[%c0_139, %c0_140], %397 {strides = array<i32>} : memref<16x64xf32, #tpu.memory_space<vmem>>, vector<16x64xf32>,
    %c0_141 = arith.constant 0 : index
    %c0_142 = arith.constant 0 : index
    %399 = vector.load %arg7[%c0_141, %c0_142] : memref<16x1xi32, #tpu.memory_space<vmem>>, vector<16x1xi32>
    %cst_143 = arith.constant dense<0xFF800000> : vector<16xf32>
    %400 = vector.multi_reduction <maximumf>, %397, %cst_143 [1] : vector<16x64xf32> to vector<16xf32>
    %401 = vector.shape_cast %400 : vector<16xf32> to vector<16x1xf32>
    %402 = vector.broadcast %401 : vector<16x1xf32> to vector<16x64xf32>
    %403 = arith.subf %397, %402 : vector<16x64xf32>
    %404 = math.exp %403 : vector<16x64xf32>
    %cst_144 = arith.constant dense<0.000000e+00> : vector<16xf32>
    %405 = vector.multi_reduction <add>, %404, %cst_144 [1] : vector<16x64xf32> to vector<16xf32>
    %406 = vector.shape_cast %405 : vector<16xf32> to vector<16x1xf32>
    %407 = math.log %406 : vector<16x1xf32>
    %408 = vector.broadcast %407 : vector<16x1xf32> to vector<16x64xf32>
    %409 = arith.subf %403, %408 : vector<16x64xf32>
    %410 = tpu.iota {dimensions = array<i32: 1>} : vector<16x64xi32>
    %411 = vector.broadcast %399 : vector<16x1xi32> to vector<16x64xi32>
    %412 = arith.cmpi eq, %410, %411 : vector<16x64xi32>
    %413 = arith.extui %412 : vector<16x64xi1> to vector<16x64xi32>
    %414 = arith.sitofp %413 : vector<16x64xi32> to vector<16x64xf32>
    %415 = arith.mulf %409, %414 : vector<16x64xf32>
    %cst_145 = arith.constant dense<0.000000e+00> : vector<16xf32>
    %416 = vector.multi_reduction <add>, %415, %cst_145 [1] : vector<16x64xf32> to vector<16xf32>
    %417 = vector.shape_cast %416 : vector<16xf32> to vector<16x1xf32>
    %cst_146 = arith.constant 0.000000e+00 : f32
    %418 = vector.broadcast %cst_146 : f32 to vector<16x1xf32>
    %419 = arith.subf %418, %417 : vector<16x1xf32>
    %c-100_i32 = arith.constant -100 : i32
    %420 = vector.broadcast %c-100_i32 : i32 to vector<16x1xi32>
    %421 = arith.cmpi ne, %399, %420 : vector<16x1xi32>
    %422 = arith.extui %421 : vector<16x1xi1> to vector<16x1xi32>
    %423 = arith.sitofp %422 : vector<16x1xi32> to vector<16x1xf32>
    %424 = arith.mulf %419, %423 : vector<16x1xf32>
    %cst_147 = arith.constant dense<0.000000e+00> : vector<1xf32>
    %425 = vector.multi_reduction <add>, %424, %cst_147 [0] : vector<16x1xf32> to vector<1xf32>
    %426 = vector.shape_cast %425 : vector<1xf32> to vector<1x1xf32>
    %cst_148 = arith.constant dense<0.000000e+00> : vector<1xf32>
    %427 = vector.multi_reduction <add>, %423, %cst_148 [0] : vector<16x1xf32> to vector<1xf32>
    %428 = vector.shape_cast %427 : vector<1xf32> to vector<1x1xf32>
    %cst_149 = arith.constant 1.000000e+00 : f32
    %429 = vector.broadcast %cst_149 : f32 to vector<1x1xf32>
    %430 = arith.maximumf %428, %429 : vector<1x1xf32>
    %431 = arith.divf %426, %430 : vector<1x1xf32>
    %c0_150 = arith.constant 0 : index
    %c0_151 = arith.constant 0 : index
    %432 = vector.load %arg28[%c0_150, %c0_151] : memref<1x1xf32, #tpu.memory_space<vmem>>, vector<1x1xf32>
    tpu.vector_store %arg28[%c0_150, %c0_151], %431 {strides = array<i32>} : memref<1x1xf32, #tpu.memory_space<vmem>>, vector<1x1xf32>,
    return
  }
  func.func @transform_0(%arg0: i32) -> (i32, i32) {
    %c0_i32 = arith.constant 0 : i32
    %c0_i32_0 = arith.constant 0 : i32
    %c0_i32_1 = arith.constant 0 : i32
    return %c0_i32, %c0_i32_0 : i32, i32
  }
  func.func @transform_1(%arg0: i32) -> (i32, i32) {
    %c0_i32 = arith.constant 0 : i32
    %c0_i32_0 = arith.constant 0 : i32
    %c0_i32_1 = arith.constant 0 : i32
    return %c0_i32, %c0_i32_0 : i32, i32
  }
  func.func @transform_2(%arg0: i32) -> (i32, i32, i32) {
    %c0_i32 = arith.constant 0 : i32
    %c0_i32_0 = arith.constant 0 : i32
    %c0_i32_1 = arith.constant 0 : i32
    %c0_i32_2 = arith.constant 0 : i32
    return %c0_i32, %c0_i32_0, %c0_i32_1 : i32, i32, i32
  }
  func.func @transform_3(%arg0: i32) -> (i32, i32, i32) {
    %c0_i32 = arith.constant 0 : i32
    %c0_i32_0 = arith.constant 0 : i32
    %c0_i32_1 = arith.constant 0 : i32
    %c0_i32_2 = arith.constant 0 : i32
    return %c0_i32, %c0_i32_0, %c0_i32_1 : i32, i32, i32
  }
  func.func @transform_4(%arg0: i32) -> (i32, i32, i32) {
    %c0_i32 = arith.constant 0 : i32
    %c0_i32_0 = arith.constant 0 : i32
    %c0_i32_1 = arith.constant 0 : i32
    %c0_i32_2 = arith.constant 0 : i32
    return %c0_i32, %c0_i32_0, %c0_i32_1 : i32, i32, i32
  }
  func.func @transform_5(%arg0: i32) -> (i32, i32, i32) {
    %c0_i32 = arith.constant 0 : i32
    %c0_i32_0 = arith.constant 0 : i32
    %c0_i32_1 = arith.constant 0 : i32
    %c0_i32_2 = arith.constant 0 : i32
    return %c0_i32, %c0_i32_0, %c0_i32_1 : i32, i32, i32
  }
  func.func @transform_6(%arg0: i32) -> (i32, i32) {
    %c0_i32 = arith.constant 0 : i32
    %c0_i32_0 = arith.constant 0 : i32
    %c0_i32_1 = arith.constant 0 : i32
    return %c0_i32, %c0_i32_0 : i32, i32
  }
  func.func @transform_7(%arg0: i32) -> (i32, i32) {
    %c0_i32 = arith.constant 0 : i32
    %c0_i32_0 = arith.constant 0 : i32
    %c0_i32_1 = arith.constant 0 : i32
    return %c0_i32, %c0_i32_0 : i32, i32
  }
  func.func @transform_8(%arg0: i32) -> (i32, i32) {
    %c0_i32 = arith.constant 0 : i32
    %c0_i32_0 = arith.constant 0 : i32
    %c0_i32_1 = arith.constant 0 : i32
    return %c0_i32, %c0_i32_0 : i32, i32
  }
  func.func @transform_9(%arg0: i32) -> (i32, i32) {
    %c0_i32 = arith.constant 0 : i32
    %c0_i32_0 = arith.constant 0 : i32
    %c0_i32_1 = arith.constant 0 : i32
    return %c0_i32, %c0_i32_0 : i32, i32
  }
  func.func @transform_10(%arg0: i32) -> (i32, i32) {
    %c0_i32 = arith.constant 0 : i32
    %c0_i32_0 = arith.constant 0 : i32
    %c0_i32_1 = arith.constant 0 : i32
    return %c0_i32, %c0_i32_0 : i32, i32
  }
  func.func @transform_11(%arg0: i32) -> (i32, i32) {
    %c0_i32 = arith.constant 0 : i32
    %c0_i32_0 = arith.constant 0 : i32
    %c0_i32_1 = arith.constant 0 : i32
    return %c0_i32, %c0_i32_0 : i32, i32
  }
  func.func @transform_12(%arg0: i32) -> (i32, i32) {
    %c0_i32 = arith.constant 0 : i32
    %c0_i32_0 = arith.constant 0 : i32
    %c0_i32_1 = arith.constant 0 : i32
    return %c0_i32, %c0_i32_0 : i32, i32
  }
  func.func @transform_13(%arg0: i32) -> (i32, i32) {
    %c0_i32 = arith.constant 0 : i32
    %c0_i32_0 = arith.constant 0 : i32
    %c0_i32_1 = arith.constant 0 : i32
    return %c0_i32, %c0_i32_0 : i32, i32
  }
  func.func @transform_14(%arg0: i32) -> (i32, i32) {
    %c0_i32 = arith.constant 0 : i32
    %c0_i32_0 = arith.constant 0 : i32
    %c0_i32_1 = arith.constant 0 : i32
    return %c0_i32, %c0_i32_0 : i32, i32
  }
  func.func @transform_15(%arg0: i32) -> (i32, i32) {
    %c0_i32 = arith.constant 0 : i32
    %c0_i32_0 = arith.constant 0 : i32
    %c0_i32_1 = arith.constant 0 : i32
    return %c0_i32, %c0_i32_0 : i32, i32
  }
  func.func @transform_16(%arg0: i32) -> (i32, i32) {
    %c0_i32 = arith.constant 0 : i32
    %c0_i32_0 = arith.constant 0 : i32
    %c0_i32_1 = arith.constant 0 : i32
    return %c0_i32, %c0_i32_0 : i32, i32
  }
  func.func @transform_17(%arg0: i32) -> (i32, i32) {
    %c0_i32 = arith.constant 0 : i32
    %c0_i32_0 = arith.constant 0 : i32
    %c0_i32_1 = arith.constant 0 : i32
    return %c0_i32, %c0_i32_0 : i32, i32
  }
  func.func @transform_18(%arg0: i32) -> (i32, i32) {
    %c0_i32 = arith.constant 0 : i32
    %c0_i32_0 = arith.constant 0 : i32
    %c0_i32_1 = arith.constant 0 : i32
    return %c0_i32, %c0_i32_0 : i32, i32
  }
  func.func @transform_19(%arg0: i32) -> (i32, i32) {
    %c0_i32 = arith.constant 0 : i32
    %c0_i32_0 = arith.constant 0 : i32
    %c0_i32_1 = arith.constant 0 : i32
    return %c0_i32, %c0_i32_0 : i32, i32
  }
  func.func @transform_20(%arg0: i32) -> (i32, i32) {
    %c0_i32 = arith.constant 0 : i32
    %c0_i32_0 = arith.constant 0 : i32
    %c0_i32_1 = arith.constant 0 : i32
    return %c0_i32, %c0_i32_0 : i32, i32
  }
  func.func @transform_21(%arg0: i32) -> (i32, i32) {
    %c0_i32 = arith.constant 0 : i32
    %c0_i32_0 = arith.constant 0 : i32
    %c0_i32_1 = arith.constant 0 : i32
    return %c0_i32, %c0_i32_0 : i32, i32
  }
  func.func @transform_22(%arg0: i32) -> (i32, i32) {
    %c0_i32 = arith.constant 0 : i32
    %c0_i32_0 = arith.constant 0 : i32
    %c0_i32_1 = arith.constant 0 : i32
    return %c0_i32, %c0_i32_0 : i32, i32
  }
  func.func @transform_23(%arg0: i32) -> (i32, i32) {
    %c0_i32 = arith.constant 0 : i32
    %c0_i32_0 = arith.constant 0 : i32
    %c0_i32_1 = arith.constant 0 : i32
    return %c0_i32, %c0_i32_0 : i32, i32
  }
  func.func @transform_24(%arg0: i32) -> (i32, i32) {
    %c0_i32 = arith.constant 0 : i32
    %c0_i32_0 = arith.constant 0 : i32
    %c0_i32_1 = arith.constant 0 : i32
    return %c0_i32, %c0_i32_0 : i32, i32
  }
  func.func @transform_25(%arg0: i32) -> (i32, i32) {
    %c0_i32 = arith.constant 0 : i32
    %c0_i32_0 = arith.constant 0 : i32
    %c0_i32_1 = arith.constant 0 : i32
    return %c0_i32, %c0_i32_0 : i32, i32
  }
  func.func @transform_26(%arg0: i32) -> (i32, i32) {
    %c0_i32 = arith.constant 0 : i32
    %c0_i32_0 = arith.constant 0 : i32
    %c0_i32_1 = arith.constant 0 : i32
    return %c0_i32, %c0_i32_0 : i32, i32
  }
  func.func @transform_27(%arg0: i32) -> (i32, i32) {
    %c0_i32 = arith.constant 0 : i32
    %c0_i32_0 = arith.constant 0 : i32
    %c0_i32_1 = arith.constant 0 : i32
    return %c0_i32, %c0_i32_0 : i32, i32
  }
}

</mosaic_0001>

<bundles_post_ra>
// kernel: t5_forward.1
= control target key start
LH: loop header
LB: loop body
LE: loop exit
PB: predicated region body
PF: predicated region fallthrough
CT: control target
= control target key end

     0   :  { %s2782_s0 = inlined_call_operand.vmem [shape: f32[16,32], index: 0, kind: input, shape index: {}]   ;;  %s2783_s1 = inlined_call_operand.vmem [shape: f32[16,32], index: 1, kind: input, shape index: {}]   ;;  %s2784_s2 = inlined_call_operand.vmem [shape: f32[2,8,8], index: 2, kind: input, shape index: {}]   ;;  %s2785_s3 = inlined_call_operand.vmem [shape: f32[2,8,8], index: 3, kind: input, shape index: {}]   ;;  %s2786_s4 = inlined_call_operand.vmem [shape: f32[2,1,8], index: 4, kind: input, shape index: {}]   ;;  %s2787_s5 = inlined_call_operand.vmem [shape: f32[2,8,8], index: 5, kind: input, shape index: {}]   ;;  %s2788_s6 = inlined_call_operand.vmem [shape: s32[16,1], index: 6, kind: input, shape index: {}]   ;;  %s2789_s7 = inlined_call_operand.vmem [shape: f32[1,32], index: 7, kind: input, shape index: {}]   ;;  %s2790_s8 = inlined_call_operand.vmem [shape: f32[32,96], index: 8, kind: input, shape index: {}]   ;;  %s2791_s9 = inlined_call_operand.vmem [shape: f32[32,32], index: 9, kind: input, shape index: {}]   ;;  %s2792_s10 = inlined_call_operand.vmem [shape: f32[1,32], index: 10, kind: input, shape index: {}]   ;;  %s2793_s11 = inlined_call_operand.vmem [shape: f32[32,64], index: 11, kind: input, shape index: {}]   ;;  %s2794_s12 = inlined_call_operand.vmem [shape: f32[64,32], index: 12, kind: input, shape index: {}]   ;;  %s2795_s13 = inlined_call_operand.vmem [shape: f32[1,32], index: 13, kind: input, shape index: {}]   ;;  %s2796_s14 = inlined_call_operand.vmem [shape: f32[1,32], index: 14, kind: input, shape index: {}]   ;;  %s2797_s15 = inlined_call_operand.vmem [shape: f32[32,96], index: 15, kind: input, shape index: {}]   ;;  %s2798_s16 = inlined_call_operand.vmem [shape: f32[32,32], index: 16, kind: input, shape index: {}]   ;;  %s2799_s17 = inlined_call_operand.vmem [shape: f32[1,32], index: 17, kind: input, shape index: {}]   ;;  %s2800_s18 = inlined_call_operand.vmem [shape: f32[32,32], index: 18, kind: input, shape index: {}]   ;;  %s2801_s19 = inlined_call_operand.vmem [shape: f32[32,64], index: 19, kind: input, shape index: {}]   ;;  %s2802_s20 = inlined_call_operand.vmem [shape: f32[32,32], index: 20, kind: input, shape index: {}]   ;;  %s2803_s21 = inlined_call_operand.vmem [shape: f32[1,32], index: 21, kind: input, shape index: {}]   ;;  %s2804_s22 = inlined_call_operand.vmem [shape: f32[32,64], index: 22, kind: input, shape index: {}]   ;;  %s2805_s23 = inlined_call_operand.vmem [shape: f32[64,32], index: 23, kind: input, shape index: {}]   ;;  %s2806_s24 = inlined_call_operand.vmem [shape: f32[1,32], index: 24, kind: input, shape index: {}]   ;;  %s2807_s25 = inlined_call_operand.vmem [shape: f32[64,32], index: 25, kind: input, shape index: {}]   ;;  %s2808_s26 = inlined_call_operand.hbm [shape: f32[16,64], index: 26, kind: output, shape index: {0}]   ;;  %s2809_s27 = inlined_call_operand.hbm [shape: f32[1,1], index: 27, kind: output, shape index: {1}]  }
   0x1   :  { %2822 = sst [smem:[#allocation8_spill]] %s2782_s0 }
   0x2   :  { %2823 = sst [smem:[#allocation9_spill]] %s2783_s1 }
   0x3   :  { %2824 = sst [smem:[#allocation10_spill]] %s2784_s2 }
   0x4   :  { %2825 = sst [smem:[#allocation11_spill]] %s2785_s3 }
   0x5   :  { %2826 = sst [smem:[#allocation12_spill]] %s2786_s4 }
   0x6   :  { %2827 = sst [smem:[#allocation13_spill]] %s2787_s5 }
   0x7   :  { %2828 = sst [smem:[#allocation14_spill]] %s2788_s6 }
   0x8   :  { %2829 = sst [smem:[#allocation15_spill]] %s2789_s7 }
   0x9   :  { %2830 = sst [smem:[#allocation16_spill]] %s2790_s8 }
   0xa   :  { %2831 = sst [smem:[#allocation17_spill]] %s2791_s9 }
   0xb   :  { %2832 = sst [smem:[#allocation18_spill]] %s2792_s10 }
   0xc   :  { %2833 = sst [smem:[#allocation19_spill]] %s2793_s11 }
   0xd   :  { %33 = vsyncpa [#allocation3], 0  ;;  %s2834_s8 = sld [smem:[#allocation8_spill]]  ;;  %vm100_vm0 = vcmask 261120  }
  0x13   :  { %v2228_v0 = vld [vmem:[%s2834_s8] sm:$0xff] }
  0x14   :  { %v98_v1 = vmul.f32 %v2228_v0, %v2228_v0 }
  0x16   :  { %v101_v2 = vsel %vm100_vm0, %v98_v1, 0.0 }
  0x17   :  { %102 = vadd.xlane.f32.xlu0 %v101_v2 }
  0x18   :  { %34 = vsyncpa [#allocation5], 0  ;;  %v2072_v3 = vmov 32.0   ;;  %s2835_s5 = sld [smem:[#allocation16_spill]]  ;;  %v2248_v13 = vld [vmem:[%s2834_s8 + $0x8] sm:$0xff]  ;;  %s2073_s8 = smov 112  }
  0x19   :  { %1932 = vrcp.f32 %v2072_v3  ;;  %v99_v14 = vmul.f32 %v2248_v13, %v2248_v13  ;;  %s2836_s4 = sld [smem:[#allocation15_spill]]  ;;  %s2074_s30 = smov 96   ;;  %vm190_vm8 = vcmask 130048   ;;  %vm215_vm9 = vcmask 64512  }
  0x1a   :  { %s2075_s9 = smov 80   ;;  %s2837_s0 = sld [smem:[#allocation12_spill]]  ;;  %vm593_vm13 = vcmask 523264  }
  0x1b   :  { %v104_v16 = vsel %vm100_vm0, %v99_v14, 0.0  ;;  %s2838_s1 = sld [smem:[#allocation10_spill]]  ;;  %s2076_s2 = smov 48  }
  0x1c   :  { %s2820_s3 = smov 64   ;;  %s2078_s7 = smov 16  }
  0x1d   :  { %s2840_s10 = sld [smem:[#allocation19_spill]] }
  0x1e   :  { %v148_v7 = vld [vmem:[%s2835_s5 + $0x18] sm:$0xff]  ;;  %v147_v8 = vld [vmem:[%s2835_s5 + $0x10] sm:$0xff]  ;;  %v146_v9 = vld [vmem:[%s2835_s5 + $0x8] sm:$0xff]  ;;  %s2843_s28 = sld [smem:[#allocation11_spill]] }
  0x1f   :  { %v1933_v4 = vpop.eup %1932  ;;  %167 = vmatpush.msra.mxu0 %v148_v7  ;;  %v145_v11 = vld [vmem:[%s2835_s5] sm:$0xff]  ;;  %105 = vadd.xlane.f32.xlu0 %v104_v16  ;;  %s2839_s5 = sld [smem:[#allocation17_spill]] }
  0x20   :  { %v108_v5 = vmul.f32 32.0, %v1933_v4  ;;  %vm112_vm1 = vweird.f32 %v1933_v4  ;;  %v1923_v26 = vld [vmem:[%s2836_s4] ss:$0 sm:$0xff]  ;;  %s2841_s4 = sld [smem:[#allocation18_spill]] }
  0x21   :  { %168 = vmatpush.msra.mxu0 %v147_v8  ;;  %v2280_v46 = vld [vmem:[%s2837_s0] ss:$0 sm:$0xff]  ;;  %v2294_v52 = vld [vmem:[%s2838_s1 + $0x8] sm:$0xff]  ;;  %s2844_s6 = sld [smem:[#allocation13_spill]] }
  0x22   :  { %v109_v6 = vsub.f32 1.0, %v108_v5  ;;  %v2285_v47 = vld [vmem:[%s2838_s1] sm:$0xff]  ;;  %v186_v54 = vadd.f32 %v2280_v46, %v2294_v52  ;;  %s2846_s11 = sld [smem:[#allocation14_spill]] }
  0x23   :  { %169 = vmatpush.msra.mxu0 %v146_v9  ;;  %v185_v48 = vadd.f32 %v2280_v46, %v2285_v47 }
  0x24   :  { %v110_v10 = vmul.f32 %v1933_v4, %v109_v6 }
  0x25   :  { %170 = vmatpush.msra.mxu0 %v145_v11  ;;  %v181_v5 = vld [vmem:[%s2839_s5 + $0x18] sm:$0xff]  ;;  %v180_v6 = vld [vmem:[%s2839_s5 + $0x10] sm:$0xff]  ;;  %v179_v7 = vld [vmem:[%s2839_s5 + $0x8] sm:$0xff] }
  0x26   :  { %v111_v12 = vadd.f32 %v1933_v4, %v110_v10  ;;  %v178_v8 = vld [vmem:[%s2839_s5] sm:$0xff]  ;;  %s2842_s5 = sld [smem:[#allocation9_spill]] }
  0x28   :  { %v2252_v15 = vsel %vm112_vm1, %v1933_v4, %v111_v12 }
  0x8a   :  { %v103_v17 = vpop.xlane.xlu0 %102 }
  0x8b   :  { %v114_v18 = vmul.f32 %v2252_v15, %v103_v17 }
  0x8d   :  { %v116_v19 = vadd.f32 1e-06, %v114_v18 }
  0x8f   :  { %1934 = vrsqrt.f32 %v116_v19  ;;  %vm124_vm3 = vweird.f32 %v116_v19 }
  0x92   :  { %v106_v31 = vpop.xlane.xlu0 %105 }
  0x93   :  { %v115_v32 = vmul.f32 %v2252_v15, %v106_v31 }
  0x95   :  { %v1935_v20 = vpop.eup %1934  ;;  %v117_v33 = vadd.f32 1e-06, %v115_v32 }
  0x96   :  { %v119_v21 = vmul.f32 %v1935_v20, %v116_v19  ;;  %vm125_vm2 = vweird.f32 %v1935_v20 }
  0x97   :  { %vm126_vm4 = vmor %vm124_vm3, %vm125_vm2  ;;  %1936 = vrsqrt.f32 %v117_v33  ;;  %vm134_vm5 = vweird.f32 %v117_v33 }
  0x98   :  { %v120_v22 = vmul.f32 %v1935_v20, %v119_v21 }
  0x9a   :  { %v121_v23 = vmul.f32 0.5, %v120_v22 }
  0x9c   :  { %v122_v24 = vsub.f32 1.5, %v121_v23 }
  0x9d   :  { %v1937_v34 = vpop.eup %1936 }
  0x9e   :  { %v123_v25 = vmul.f32 %v1935_v20, %v122_v24  ;;  %v129_v35 = vmul.f32 %v1937_v34, %v117_v33  ;;  %vm135_vm6 = vweird.f32 %v1937_v34 }
  0x9f   :  { %vm136_vm7 = vmor %vm134_vm5, %vm135_vm6 }
  0xa0   :  { %v127_v27 = vsel %vm126_vm4, %v1935_v20, %v123_v25  ;;  %v130_v36 = vmul.f32 %v1937_v34, %v129_v35 }
  0xa1   :  { %v138_v28 = vmul.f32 %v127_v27, %v2228_v0  ;;  %v2337_v27 = vld [vmem:[%s2837_s0 + $0x1] ss:$0 sm:$0xff] }
  0xa2   :  { %v131_v37 = vmul.f32 0.5, %v130_v36  ;;  %v349_v32 = vadd.f32 %v2337_v27, %v2285_v47 }
  0xa3   :  { %v143_v29 = vmul.f32 %v1923_v26, %v138_v28  ;;  %v350_v28 = vadd.f32 %v2337_v27, %v2294_v52 }
  0xa4   :  { %v132_v38 = vsub.f32 1.5, %v131_v37 }
  0xa5   :  { %1836 = vmatmul.msk.f32.vlgmr.msra.gmra.mxu0 %vm100_vm0, %v143_v29 }
  0xa6   :  { %v133_v39 = vmul.f32 %v1937_v34, %v132_v38 }
  0xa8   :  { %v137_v40 = vsel %vm136_vm7, %v1937_v34, %v133_v39 }
  0xa9   :  { %v139_v41 = vmul.f32 %v137_v40, %v2248_v13 }
  0xab   :  { %v144_v42 = vmul.f32 %v1923_v26, %v139_v41 }
  0xad   :  { %1837 = vmatmul.msk.f32.gmra.mxu0 %vm100_vm0, %v144_v42 }
 0x122   :  { %v2261_v30 = vpop.f32.mrf.mxu0 }
 0x123   :  { %253 = vrot.lane.b32.xlu2 %v2261_v30, %s2073_s8  ;;  %188 = vrot.lane.b32.xlu1 %v2261_v30, %s2074_s30 }
 0x12a   :  { %v2289_v49 = vpop.f32.mrf.mxu0 }
 0x12b   :  { %255 = vrot.lane.b32.xlu1 %v2261_v30, %s2075_s9 }
 0x17d   :  { %v254_v45 = vpop.permute.xlu2 %253 }
 0x195   :  { %v189_v43 = vpop.permute.xlu1 %188 }
 0x196   :  { %1838 = vmatpush.xpose.msk.msra.mxu1 %vm190_vm8, %v189_v43 }
 0x199   :  { %1839 = vmatmul.msk.f32.vlgmr.msra.gmra.mxu1 %vm190_vm8, %v2261_v30 }
 0x19a   :  { %338 = vmatpush.msrb.mxu1 %v181_v5 }
 0x19c   :  { %339 = vmatpush.msrb.mxu1 %v180_v6 }
 0x19d   :  { %v256_v44 = vpop.permute.xlu1 %255 }
 0x19e   :  { %1841 = vmatpush.xpose.msk.msrb.mxu0 %vm190_vm8, %v256_v44  ;;  %340 = vmatpush.msrb.mxu1 %v179_v7 }
 0x1a0   :  { %341 = vmatpush.msrb.mxu1 %v178_v8 }
 0x1a1   :  { %1842 = vmatmul.msk.f32.vlgmr.msrb.gmra.mxu0 %vm190_vm8, %v254_v45 }
 0x1a2   :  { %500 = vmatpush.msra.mxu0 %v181_v5  ;;  %v552_v5 = vld [vmem:[%s2840_s10 + $0x10] sm:$0xff] }
 0x1a4   :  { %501 = vmatpush.msra.mxu0 %v180_v6  ;;  %v1926_v6 = vld [vmem:[%s2841_s4] ss:$0 sm:$0xff]  ;;  %s2845_s4 = smov 64  }
 0x1a6   :  { %502 = vmatpush.msra.mxu0 %v179_v7 }
 0x1a8   :  { %503 = vmatpush.msra.mxu0 %v178_v8  ;;  %v551_v8 = vld [vmem:[%s2840_s10 + $0x8] sm:$0xff] }
 0x216   :  { %v212_v50 = vpop.f32.mrf.mxu1 }
 0x217   :  { %v213_v51 = vadd.f32 %v212_v50, %v185_v48 }
 0x219   :  { %v216_v53 = vsel %vm215_vm9, %v213_v51, -inf }
 0x21a   :  { %217 = vmax.xlane.f32.xlu2 %v216_v53 }
 0x21e   :  { %v278_v55 = vpop.f32.mrf.mxu0 }
 0x21f   :  { %v279_v56 = vadd.f32 %v278_v55, %v186_v54 }
 0x221   :  { %v281_v57 = vsel %vm215_vm9, %v279_v56, -inf }
 0x222   :  { %282 = vmax.xlane.f32.xlu0 %v281_v57 }
 0x232   :  { %292 = vrot.lane.b32.xlu2 %v2261_v30, %s2076_s2 }
 0x28d   :  { %v218_v58 = vpop.xlane.xlu2 %217 }
 0x28e   :  { %v219_v59 = vsub.f32 %v213_v51, %v218_v58 }
 0x290   :  { %v220_v60 = vmul.f32 1.442695, %v219_v59 }
 0x292   :  { %1938 = vpow2.f32 %v220_v60 }
 0x295   :  { %v283_v61 = vpop.xlane.xlu0 %282  ;;  %v293_v17 = vpop.permute.xlu2 %292 }
 0x296   :  { %v284_v62 = vsub.f32 %v279_v56, %v283_v61 }
 0x298   :  { %v1939_v63 = vpop.eup %1938  ;;  %v285_v1 = vmul.f32 1.442695, %v284_v62 }
 0x299   :  { %v222_v2 = vsel %vm215_vm9, %v1939_v63, 0.0 }
 0x29a   :  { %1940 = vpow2.f32 %v285_v1  ;;  %223 = vadd.xlane.f32.xlu1 %v222_v2 }
 0x2a0   :  { %v1941_v3 = vpop.eup %1940 }
 0x2a1   :  { %v287_v4 = vsel %vm215_vm9, %v1941_v3, 0.0 }
 0x2a2   :  { %288 = vadd.xlane.f32.xlu0 %v287_v4 }
 0x2b3   :  { %417 = vrot.lane.b32.xlu1 %v2289_v49, %s2075_s9 }
 0x2b6   :  { %227 = vrot.lane.b32.xlu0 %v2261_v30, %s2820_s3 }
 0x30d   :  { %v224_v9 = vpop.xlane.xlu1 %223 }
 0x30e   :  { %1942 = vrcp.f32 %v224_v9  ;;  %v550_v9 = vld [vmem:[%s2840_s10] sm:$0xff] }
 0x314   :  { %v1943_v11 = vpop.eup %1942 }
 0x315   :  { %v289_v10 = vpop.xlane.xlu0 %288  ;;  %v226_v16 = vmul.f32 %v1943_v11, %v1939_v63  ;;  %v592_v11 = vld [vmem:[%s2794_s12 + $0x38] sm:$0xff] }
 0x316   :  { %1944 = vrcp.f32 %v289_v10 }
 0x31c   :  { %v1945_v18 = vpop.eup %1944 }
 0x31d   :  { %v291_v19 = vmul.f32 %v1945_v18, %v1941_v3  ;;  %v553_v3 = vld [vmem:[%s2840_s10 + $0x18] sm:$0xff]  ;;  %v587_v18 = vld [vmem:[%s2794_s12 + $0x10] sm:$0xff] }
 0x325   :  { %v418_v12 = vpop.permute.xlu1 %417 }
 0x326   :  { %1848 = vmatpush.xpose.msk.msra.mxu1 %vm190_vm8, %v418_v12  ;;  %v591_v12 = vld [vmem:[%s2794_s12 + $0x30] sm:$0xff] }
 0x328   :  { %v228_v14 = vpop.permute.xlu0 %227 }
 0x329   :  { %248 = vmatpush.msra.mxu2 %v228_v14  ;;  %v590_v14 = vld [vmem:[%s2794_s12 + $0x28] sm:$0xff] }
 0x32a   :  { %1840 = vmatmul.msk.f32.vlgmr.msra.gmra.mxu2 %vm215_vm9, %v226_v16  ;;  %v589_v16 = vld [vmem:[%s2794_s12 + $0x20] sm:$0xff] }
 0x32b   :  { %313 = vmatpush.msrb.mxu2 %v293_v17  ;;  %v588_v17 = vld [vmem:[%s2794_s12 + $0x18] sm:$0xff] }
 0x332   :  { %1843 = vmatmul.msk.f32.vlgmr.msrb.gmra.mxu2 %vm215_vm9, %v291_v19  ;;  %v586_v19 = vld [vmem:[%s2794_s12 + $0x8] sm:$0xff] }
 0x3ad   :  { %v250_v20 = vpop.f32.mrf.mxu2 }
 0x3b5   :  { %v315_v21 = vpop.f32.mrf.mxu2 }
 0x3b6   :  { %319 = vrot.lane.b32.xlu0 %v315_v21, %s2078_s7 }
 0x3be   :  { %415 = vrot.lane.b32.xlu0 %v2289_v49, %s2073_s8 }
 0x3c6   :  { %352 = vrot.lane.b32.xlu0 %v2289_v49, %s2074_s30 }
 0x428   :  { %v320_v22 = vpop.permute.xlu0 %319 }
 0x429   :  { %v322_v23 = vsel %vm190_vm8, %v250_v20, %v320_v22  ;;  %v585_v20 = vld [vmem:[%s2794_s12] sm:$0xff]  ;;  %s2081_s12 = smov [#allocation2]  }
 0x42a   :  { %1844 = vmatmul.msk.f32.vlgmr.msrb.gmra.mxu1 %vm100_vm0, %v322_v23  ;;  %s1806_s10 = sshll.u32 %s2081_s12, 4  ;;  %s1807_s10 = int_to_ptr.vmem [resolvable:$true] %s1806_s10 }
 0x430   :  { %v416_v24 = vpop.permute.xlu0 %415 }
 0x432   :  { %1849 = vmatmul.msk.f32.vlgmr.msra.gmra.mxu1 %vm190_vm8, %v416_v24 }
 0x438   :  { %v353_v25 = vpop.permute.xlu0 %352 }
 0x439   :  { %1845 = vmatpush.xpose.msk.msra.mxu3 %vm190_vm8, %v353_v25 }
 0x43c   :  { %1846 = vmatmul.msk.f32.vlgmr.msra.gmra.mxu3 %vm190_vm8, %v2289_v49 }
 0x4a7   :  { %v343_v26 = vpop.f32.mrf.mxu1 }
 0x4a8   :  { %v2348_v36 = vadd.f32 %v343_v26, %v2228_v0 }
 0x4aa   :  { %v511_v37 = vmul.f32 %v2348_v36, %v2348_v36 }
 0x4ac   :  { %v513_v38 = vsel %vm100_vm0, %v511_v37, 0.0 }
 0x4af   :  { %v440_v29 = vpop.f32.mrf.mxu1 }
 0x4b0   :  { %v441_v30 = vadd.f32 %v440_v29, %v350_v28 }
 0x4b2   :  { %v443_v31 = vsel %vm215_vm9, %v441_v30, -inf }
 0x4b3   :  { %444 = vmax.xlane.f32.xlu2 %v443_v31 }
 0x4bf   :  { %v375_v33 = vpop.f32.mrf.mxu3 }
 0x4c0   :  { %v376_v34 = vadd.f32 %v375_v33, %v349_v32  ;;  %v2414_v32 = vld [vmem:[%s2842_s5] sm:$0xff] }
 0x4c1   :  { %v668_v33 = vmul.f32 %v2414_v32, %v2414_v32 }
 0x4c2   :  { %v378_v35 = vsel %vm215_vm9, %v376_v34, -inf }
 0x4c3   :  { %379 = vmax.xlane.f32.xlu0 %v378_v35 }
 0x4cb   :  { %454 = vrot.lane.b32.xlu2 %v2289_v49, %s2076_s2 }
 0x4f4   :  { %514 = vadd.xlane.f32.xlu2 %v513_v38 }
 0x526   :  { %v445_v39 = vpop.xlane.xlu2 %444 }
 0x527   :  { %v446_v40 = vsub.f32 %v441_v30, %v445_v39 }
 0x529   :  { %v447_v41 = vmul.f32 1.442695, %v446_v40 }
 0x52b   :  { %1946 = vpow2.f32 %v447_v41 }
 0x52e   :  { %v455_v42 = vpop.permute.xlu2 %454 }
 0x52f   :  { %475 = vmatpush.msrb.mxu3 %v455_v42 }
 0x531   :  { %v1947_v43 = vpop.eup %1946  ;;  %608 = vmatpush.msra.mxu3 %v592_v11 }
 0x532   :  { %v449_v44 = vsel %vm215_vm9, %v1947_v43, 0.0 }
 0x533   :  { %450 = vadd.xlane.f32.xlu1 %v449_v44  ;;  %609 = vmatpush.msra.mxu3 %v591_v12 }
 0x535   :  { %610 = vmatpush.msra.mxu3 %v590_v14 }
 0x536   :  { %v380_v45 = vpop.xlane.xlu0 %379 }
 0x537   :  { %v381_v47 = vsub.f32 %v376_v34, %v380_v45  ;;  %611 = vmatpush.msra.mxu3 %v589_v16  ;;  %v670_v34 = vsel %vm100_vm0, %v668_v33, 0.0 }
 0x539   :  { %v382_v0 = vmul.f32 1.442695, %v381_v47  ;;  %612 = vmatpush.msra.mxu3 %v588_v17 }
 0x53b   :  { %1948 = vpow2.f32 %v382_v0  ;;  %613 = vmatpush.msra.mxu3 %v587_v18 }
 0x53d   :  { %614 = vmatpush.msra.mxu3 %v586_v19 }
 0x53f   :  { %615 = vmatpush.msra.mxu3 %v585_v20 }
 0x541   :  { %v1949_v48 = vpop.eup %1948 }
 0x542   :  { %v384_v50 = vsel %vm215_vm9, %v1949_v48, 0.0 }
 0x543   :  { %385 = vadd.xlane.f32.xlu0 %v384_v50 }
 0x54c   :  { %389 = vrot.lane.b32.xlu1 %v2289_v49, %s2820_s3 }
 0x567   :  { %v515_v51 = vpop.xlane.xlu2 %514 }
 0x568   :  { %v519_v52 = vmul.f32 %v515_v51, %v2252_v15  ;;  %v710_v51 = vld [vmem:[%s2797_s15 + $0x18] sm:$0xff] }
 0x56a   :  { %v521_v53 = vadd.f32 1e-06, %v519_v52  ;;  %v709_v52 = vld [vmem:[%s2797_s15 + $0x10] sm:$0xff] }
 0x56c   :  { %1950 = vrsqrt.f32 %v521_v53  ;;  %vm529_vm11 = vweird.f32 %v521_v53 }
 0x572   :  { %v1951_v55 = vpop.eup %1950 }
 0x573   :  { %v524_v56 = vmul.f32 %v1951_v55, %v521_v53  ;;  %vm530_vm10 = vweird.f32 %v1951_v55  ;;  %v708_v53 = vld [vmem:[%s2797_s15 + $0x8] sm:$0xff] }
 0x574   :  { %vm531_vm12 = vmor %vm529_vm11, %vm530_vm10 }
 0x575   :  { %v525_v59 = vmul.f32 %v1951_v55, %v524_v56  ;;  %v2438_v56 = vld [vmem:[%s2842_s5 + $0x8] sm:$0xff]  ;;  %s1822_s5 = sshll.u32 %s2809_s27, 4  ;;  %s1823_s5 = int_to_ptr.hbm [resolvable:$true] %s1822_s5 }
 0x576   :  { %671 = vadd.xlane.f32.xlu1 %v670_v34 }
 0x577   :  { %v526_v60 = vmul.f32 0.5, %v525_v59 }
 0x579   :  { %v527_v62 = vsub.f32 1.5, %v526_v60 }
 0x57b   :  { %v528_v63 = vmul.f32 %v1951_v55, %v527_v62 }
 0x57d   :  { %v532_v4 = vsel %vm531_vm12, %v1951_v55, %v528_v63 }
 0x57e   :  { %v543_v7 = vmul.f32 %v532_v4, %v2348_v36 }
 0x580   :  { %v548_v10 = vmul.f32 %v1926_v6, %v543_v7 }
 0x5a6   :  { %v451_v54 = vpop.xlane.xlu1 %450 }
 0x5a7   :  { %1952 = vrcp.f32 %v451_v54  ;;  %v707_v54 = vld [vmem:[%s2797_s15] sm:$0xff]  ;;  %s2082_s15 = smov 128  }
 0x5ad   :  { %v1953_v57 = vpop.eup %1952 }
 0x5ae   :  { %v453_v58 = vmul.f32 %v1953_v57, %v1947_v43  ;;  %v669_v57 = vmul.f32 %v2438_v56, %v2438_v56 }
 0x5b0   :  { %1850 = vmatmul.msk.f32.vlgmr.msrb.gmra.mxu3 %vm215_vm9, %v453_v58  ;;  %v673_v59 = vsel %vm100_vm0, %v669_v57, 0.0 }
 0x5b1   :  { %729 = vmatpush.msrb.mxu3 %v710_v51  ;;  %674 = vadd.xlane.f32.xlu1 %v673_v59 }
 0x5b3   :  { %730 = vmatpush.msrb.mxu3 %v709_v52 }
 0x5b5   :  { %731 = vmatpush.msrb.mxu3 %v708_v53 }
 0x5b6   :  { %v386_v61 = vpop.xlane.xlu0 %385 }
 0x5b7   :  { %1954 = vrcp.f32 %v386_v61  ;;  %732 = vmatpush.msrb.mxu3 %v707_v54 }
 0x5bd   :  { %v1955_v49 = vpop.eup %1954 }
 0x5be   :  { %v388_v1 = vmul.f32 %v1955_v49, %v1949_v48  ;;  %v390_v2 = vpop.permute.xlu1 %389 }
 0x5bf   :  { %410 = vmatpush.msra.mxu2 %v390_v2 }
 0x5c0   :  { %1847 = vmatmul.msk.f32.vlgmr.msra.gmra.mxu2 %vm215_vm9, %v388_v1 }
 0x5c1   :  { %572 = vmatpush.msrb.mxu2 %v553_v3  ;;  %v1927_v3 = vld [vmem:[%s2796_s14] ss:$0 sm:$0xff] }
 0x5c3   :  { %573 = vmatpush.msrb.mxu2 %v552_v5 }
 0x5c5   :  { %574 = vmatpush.msrb.mxu2 %v551_v8 }
 0x5c7   :  { %575 = vmatpush.msrb.mxu2 %v550_v9 }
 0x5c8   :  { %1852 = vmatmul.msk.f32.vlgmr.msrb.gmra.mxu2 %vm100_vm0, %v548_v10 }
 0x5e9   :  { %v672_v0 = vpop.xlane.xlu1 %671 }
 0x5ea   :  { %v676_v48 = vmul.f32 %v672_v0, %v2252_v15 }
 0x5ec   :  { %v678_v50 = vadd.f32 1e-06, %v676_v48 }
 0x5ee   :  { %vm686_vm2 = vweird.f32 %v678_v50 }
 0x624   :  { %v675_v9 = vpop.xlane.xlu1 %674 }
 0x625   :  { %v677_v10 = vmul.f32 %v675_v9, %v2252_v15  ;;  %v742_v9 = vld [vmem:[%s2798_s16 + $0x10] sm:$0xff] }
 0x627   :  { %v679_v11 = vadd.f32 1e-06, %v677_v10  ;;  %v741_v10 = vld [vmem:[%s2798_s16 + $0x8] sm:$0xff] }
 0x629   :  { %vm696_vm5 = vweird.f32 %v679_v11 }
 0x633   :  { %v477_v21 = vpop.f32.mrf.mxu3 }
 0x634   :  { %481 = vrot.lane.b32.xlu0 %v477_v21, %s2078_s7 }
 0x643   :  { %v412_v22 = vpop.f32.mrf.mxu2 }
 0x64b   :  { %v577_v23 = vpop.f32.mrf.mxu2 }
 0x64c   :  { %v583_v24 = vmax.f32 %v577_v23, 0.0 }
 0x64e   :  { %1854 = vmatmul.msk.f32.vlgmr.msra.gmra.mxu3 %vm593_vm13, %v583_v24 }
 0x6a6   :  { %v482_v25 = vpop.permute.xlu0 %481 }
 0x6a7   :  { %v484_v26 = vsel %vm190_vm8, %v412_v22, %v482_v25 }
 0x6a8   :  { %1851 = vmatmul.msk.f32.vlgmr.msra.gmra.mxu0 %vm100_vm0, %v484_v26  ;;  %v2466_v26 = vld [vmem:[%s2843_s28] sm:$0xff] }
 0x725   :  { %v505_v28 = vpop.f32.mrf.mxu0 }
 0x726   :  { %v2406_v29 = vadd.f32 %v505_v28, %v2248_v13  ;;  %v93_v28 = vld [vmem:[%s2844_s6] sm:$0xff] }
 0x728   :  { %v512_v30 = vmul.f32 %v2406_v29, %v2406_v29 }
 0x72a   :  { %v516_v31 = vsel %vm100_vm0, %v512_v30, 0.0  ;;  %v744_v30 = vadd.f32 %v93_v28, %v2466_v26 }
 0x72b   :  { %517 = vadd.xlane.f32.xlu0 %v516_v31  ;;  %v90_v31 = vld [vmem:[%s2843_s28 + $0x8] sm:$0xff] }
 0x72c   :  { %v745_v34 = vadd.f32 %v93_v28, %v90_v31 }
 0x79e   :  { %v518_v35 = vpop.xlane.xlu0 %517 }
 0x79f   :  { %v520_v13 = vmul.f32 %v518_v35, %v2252_v15 }
 0x7a1   :  { %v522_v37 = vadd.f32 1e-06, %v520_v13 }
 0x7a3   :  { %1956 = vrsqrt.f32 %v522_v37  ;;  %vm539_vm15 = vweird.f32 %v522_v37 }
 0x7a4   :  { %1958 = vrsqrt.f32 %v678_v50 }
 0x7a5   :  { %1960 = vrsqrt.f32 %v679_v11 }
 0x7a9   :  { %v1957_v38 = vpop.eup %1956 }
 0x7aa   :  { %v534_v39 = vmul.f32 %v1957_v38, %v522_v37  ;;  %vm540_vm14 = vweird.f32 %v1957_v38  ;;  %v1959_v55 = vpop.eup %1958 }
 0x7ab   :  { %vm541_vm1 = vmor %vm539_vm15, %vm540_vm14  ;;  %v681_v58 = vmul.f32 %v1959_v55, %v678_v50  ;;  %vm687_vm3 = vweird.f32 %v1959_v55  ;;  %v1961_v12 = vpop.eup %1960 }
 0x7ac   :  { %v535_v40 = vmul.f32 %v1957_v38, %v534_v39  ;;  %vm688_vm4 = vmor %vm686_vm2, %vm687_vm3  ;;  %v691_v14 = vmul.f32 %v1961_v12, %v679_v11  ;;  %vm697_vm6 = vweird.f32 %v1961_v12 }
 0x7ad   :  { %v682_v60 = vmul.f32 %v1959_v55, %v681_v58  ;;  %vm698_vm7 = vmor %vm696_vm5, %vm697_vm6 }
 0x7ae   :  { %v536_v41 = vmul.f32 0.5, %v535_v40  ;;  %v692_v16 = vmul.f32 %v1961_v12, %v691_v14 }
 0x7af   :  { %v683_v61 = vmul.f32 0.5, %v682_v60 }
 0x7b0   :  { %v537_v42 = vsub.f32 1.5, %v536_v41  ;;  %v693_v17 = vmul.f32 0.5, %v692_v16 }
 0x7b1   :  { %v684_v62 = vsub.f32 1.5, %v683_v61 }
 0x7b2   :  { %v538_v43 = vmul.f32 %v1957_v38, %v537_v42  ;;  %v694_v18 = vsub.f32 1.5, %v693_v17  ;;  %v740_v17 = vld [vmem:[%s2798_s16] sm:$0xff] }
 0x7b3   :  { %v685_v63 = vmul.f32 %v1959_v55, %v684_v62 }
 0x7b4   :  { %v542_v44 = vsel %vm541_vm1, %v1957_v38, %v538_v43  ;;  %v695_v19 = vmul.f32 %v1961_v12, %v694_v18 }
 0x7b5   :  { %v544_v45 = vmul.f32 %v542_v44, %v2406_v29  ;;  %v689_v2 = vsel %vm688_vm4, %v1959_v55, %v685_v63 }
 0x7b6   :  { %v700_v4 = vmul.f32 %v689_v2, %v2414_v32  ;;  %v699_v20 = vsel %vm698_vm7, %v1961_v12, %v695_v19 }
 0x7b7   :  { %v549_v47 = vmul.f32 %v1926_v6, %v544_v45  ;;  %v2449_v6 = vpop.f32.mrf.mxu3  ;;  %v701_v21 = vmul.f32 %v699_v20, %v2438_v56 }
 0x7b8   :  { %v705_v5 = vmul.f32 %v1927_v3, %v700_v4 }
 0x7b9   :  { %1853 = vmatmul.msk.f32.gmra.mxu2 %vm100_vm0, %v549_v47  ;;  %v706_v22 = vmul.f32 %v1927_v3, %v701_v21 }
 0x83c   :  { %v580_v49 = vpop.f32.mrf.mxu2 }
 0x83d   :  { %v584_v1 = vmax.f32 %v580_v49, 0.0 }
 0x83f   :  { %1855 = vmatmul.msk.f32.gmra.mxu3 %vm593_vm13, %v584_v1  ;;  %v94_v1 = vld [vmem:[%s2844_s6 + $0x8] sm:$0xff] }
 0x840   :  { %v904_v2 = vadd.f32 %v94_v1, %v90_v31  ;;  %v903_v11 = vadd.f32 %v94_v1, %v2466_v26 }
 0x847   :  { %1856 = vmatmul.msk.f32.vlgmr.msrb.gmra.mxu3 %vm100_vm0, %v705_v5 }
 0x84f   :  { %1857 = vmatmul.msk.f32.gmra.mxu3 %vm100_vm0, %v706_v22 }
 0x8c2   :  { %v2451_v7 = vpop.f32.mrf.mxu3 }
 0x8ca   :  { %v734_v8 = vpop.f32.mrf.mxu3 }
 0x8cb   :  { %747 = vrot.lane.b32.xlu1 %v734_v8, %s2074_s30  ;;  %810 = vrot.lane.b32.xlu0 %v734_v8, %s2073_s8 }
 0x8cc   :  { %812 = vrot.lane.b32.xlu2 %v734_v8, %s2075_s9 }
 0x8d2   :  { %v2477_v40 = vpop.f32.mrf.mxu3 }
 0x926   :  { %v813_v23 = vpop.permute.xlu2 %812 }
 0x927   :  { %1861 = vmatpush.xpose.msk.msra.mxu2 %vm190_vm8, %v813_v23 }
 0x93d   :  { %v748_v24 = vpop.permute.xlu1 %747  ;;  %v811_v25 = vpop.permute.xlu0 %810 }
 0x93e   :  { %1858 = vmatpush.xpose.msk.msrb.mxu0 %vm190_vm8, %v748_v24  ;;  %1862 = vmatmul.msk.f32.vlgmr.msra.gmra.mxu2 %vm190_vm8, %v811_v25 }
 0x941   :  { %1859 = vmatmul.msk.f32.vlgmr.msrb.gmra.mxu0 %vm190_vm8, %v734_v8 }
 0x9be   :  { %v770_v33 = vpop.f32.mrf.mxu0 }
 0x9bf   :  { %v771_v35 = vadd.f32 %v770_v33, %v744_v30 }
 0x9c1   :  { %v835_v13 = vpop.f32.mrf.mxu2  ;;  %v773_v37 = vsel %vm215_vm9, %v771_v35, -inf }
 0x9c2   :  { %v836_v38 = vadd.f32 %v835_v13, %v745_v34  ;;  %774 = vmax.xlane.f32.xlu0 %v773_v37 }
 0x9c4   :  { %v838_v39 = vsel %vm215_vm9, %v836_v38, -inf }
 0x9c5   :  { %839 = vmax.xlane.f32.xlu2 %v838_v39 }
 0x9d6   :  { %971 = vrot.lane.b32.xlu0 %v2477_v40, %s2075_s9 }
 0x9dd   :  { %849 = vrot.lane.b32.xlu2 %v734_v8, %s2076_s2 }
 0x9de   :  { %906 = vrot.lane.b32.xlu0 %v2477_v40, %s2074_s30 }
 0x9e6   :  { %784 = vrot.lane.b32.xlu0 %v734_v8, %s2845_s4  ;;  %v743_v8 = vld [vmem:[%s2798_s16 + $0x18] sm:$0xff] }
 0xa35   :  { %v775_v41 = vpop.xlane.xlu0 %774 }
 0xa36   :  { %v776_v42 = vsub.f32 %v771_v35, %v775_v41  ;;  %v623_v35 = vadd.f32 %v2449_v6, %v2348_v36 }
 0xa38   :  { %v777_v43 = vmul.f32 1.442695, %v776_v42  ;;  %v840_v44 = vpop.xlane.xlu2 %839  ;;  %v626_v13 = vmul.f32 %v623_v35, %v623_v35 }
 0xa39   :  { %v841_v45 = vsub.f32 %v836_v38, %v840_v44 }
 0xa3a   :  { %1962 = vpow2.f32 %v777_v43  ;;  %v628_v37 = vsel %vm100_vm0, %v626_v13, 0.0 }
 0xa3b   :  { %v842_v47 = vmul.f32 1.442695, %v841_v45 }
 0xa3d   :  { %1964 = vpow2.f32 %v842_v47 }
 0xa40   :  { %v1963_v0 = vpop.eup %1962  ;;  %v850_v48 = vpop.permute.xlu2 %849 }
 0xa41   :  { %870 = vmatpush.msra.mxu3 %v850_v48  ;;  %v779_v50 = vsel %vm215_vm9, %v1963_v0, 0.0  ;;  %v1138_v48 = vld [vmem:[%s2801_s19 + $0x8] sm:$0xff] }
 0xa42   :  { %780 = vadd.xlane.f32.xlu2 %v779_v50  ;;  %v1137_v50 = vld [vmem:[%s2801_s19] sm:$0xff] }
 0xa43   :  { %v1965_v51 = vpop.eup %1964 }
 0xa44   :  { %v844_v52 = vsel %vm215_vm9, %v1965_v51, 0.0 }
 0xa45   :  { %845 = vadd.xlane.f32.xlu1 %v844_v52 }
 0xa48   :  { %v972_v53 = vpop.permute.xlu0 %971 }
 0xa49   :  { %1868 = vmatpush.xpose.msk.msrb.mxu3 %vm190_vm8, %v972_v53 }
 0xa50   :  { %v907_v54 = vpop.permute.xlu0 %906 }
 0xa51   :  { %1865 = vmatpush.xpose.msk.msrb.mxu2 %vm190_vm8, %v907_v54 }
 0xa54   :  { %1866 = vmatmul.msk.f32.vlgmr.msrb.gmra.mxu2 %vm190_vm8, %v2477_v40 }
 0xa55   :  { %1054 = vmatpush.msra.mxu2 %v743_v8 }
 0xa57   :  { %1055 = vmatpush.msra.mxu2 %v742_v9 }
 0xa58   :  { %v785_v55 = vpop.permute.xlu0 %784 }
 0xa59   :  { %805 = vmatpush.msra.mxu0 %v785_v55  ;;  %1056 = vmatpush.msra.mxu2 %v741_v10 }
 0xa5b   :  { %895 = vmatpush.msrb.mxu0 %v743_v8  ;;  %1057 = vmatpush.msra.mxu2 %v740_v17 }
 0xa5d   :  { %896 = vmatpush.msrb.mxu0 %v742_v9 }
 0xa5e   :  { %969 = vrot.lane.b32.xlu1 %v2477_v40, %s2073_s8 }
 0xa5f   :  { %897 = vmatpush.msrb.mxu0 %v741_v10 }
 0xa61   :  { %898 = vmatpush.msrb.mxu0 %v740_v17 }
 0xab5   :  { %v781_v57 = vpop.xlane.xlu2 %780 }
 0xab6   :  { %1966 = vrcp.f32 %v781_v57 }
 0xab8   :  { %v846_v58 = vpop.xlane.xlu1 %845 }
 0xab9   :  { %1968 = vrcp.f32 %v846_v58 }
 0xabc   :  { %v1967_v59 = vpop.eup %1966 }
 0xabd   :  { %v783_v60 = vmul.f32 %v1967_v59, %v1963_v0  ;;  %v1139_v0 = vld [vmem:[%s2801_s19 + $0x10] sm:$0xff] }
 0xabf   :  { %v1969_v61 = vpop.eup %1968  ;;  %1860 = vmatmul.msk.f32.vlgmr.msra.gmra.mxu0 %vm215_vm9, %v783_v60 }
 0xac0   :  { %v848_v62 = vmul.f32 %v1969_v61, %v1965_v51  ;;  %v2550_v61 = vld [vmem:[%s2795_s13] ss:$0 sm:$0xff] }
 0xac2   :  { %1863 = vmatmul.msk.f32.vlgmr.msra.gmra.mxu3 %vm215_vm9, %v848_v62 }
 0xad0   :  { %v970_v63 = vpop.permute.xlu1 %969 }
 0xad1   :  { %1869 = vmatmul.msk.f32.vlgmr.msrb.gmra.mxu3 %vm190_vm8, %v970_v63 }
 0xad7   :  { %v929_v12 = vpop.f32.mrf.mxu2 }
 0xad8   :  { %v930_v14 = vadd.f32 %v929_v12, %v903_v11 }
 0xada   :  { %v932_v16 = vsel %vm215_vm9, %v930_v14, -inf }
 0xb3c   :  { %v807_v18 = vpop.f32.mrf.mxu0 }
 0xb45   :  { %v872_v49 = vpop.f32.mrf.mxu3 }
 0xb46   :  { %876 = vrot.lane.b32.xlu0 %v872_v49, %s2078_s7  ;;  %v1107_v49 = vld [vmem:[%s2800_s18 + $0x18] sm:$0xff] }
 0xb54   :  { %v994_v3 = vpop.f32.mrf.mxu3 }
 0xb55   :  { %v995_v4 = vadd.f32 %v994_v3, %v904_v2  ;;  %v1106_v2 = vld [vmem:[%s2800_s18 + $0x10] sm:$0xff]  ;;  %v1105_v3 = vld [vmem:[%s2800_s18 + $0x8] sm:$0xff] }
 0xb57   :  { %v997_v5 = vsel %vm215_vm9, %v995_v4, -inf }
 0xb58   :  { %998 = vmax.xlane.f32.xlu1 %v997_v5 }
 0xb70   :  { %933 = vmax.xlane.f32.xlu0 %v932_v16 }
 0xb84   :  { %943 = vrot.lane.b32.xlu0 %v2477_v40, %s2845_s4  ;;  %s1808_s4 = sshll.u32 %s2808_s26, 4  ;;  %s2084_s26 = smov [#allocation4]   ;;  %s1809_s4 = int_to_ptr.hbm [resolvable:$true] %s1808_s4 }
 0xbb8   :  { %v877_v19 = vpop.permute.xlu0 %876 }
 0xbb9   :  { %v879_v20 = vsel %vm190_vm8, %v807_v18, %v877_v19  ;;  %v2570_v18 = vld [vmem:[%s2799_s17] ss:$0 sm:$0xff] }
 0xbba   :  { %1864 = vmatmul.msk.f32.vlgmr.msrb.gmra.mxu0 %vm100_vm0, %v879_v20 }
 0xbcb   :  { %v999_v21 = vpop.xlane.xlu1 %998 }
 0xbcc   :  { %v1000_v22 = vsub.f32 %v995_v4, %v999_v21  ;;  %v1104_v4 = vld [vmem:[%s2800_s18] sm:$0xff] }
 0xbce   :  { %v1001_v23 = vmul.f32 1.442695, %v1000_v22 }
 0xbd0   :  { %1970 = vpow2.f32 %v1001_v23 }
 0xbd6   :  { %v1971_v24 = vpop.eup %1970 }
 0xbd7   :  { %v1003_v25 = vsel %vm215_vm9, %v1971_v24, 0.0 }
 0xbd8   :  { %1004 = vadd.xlane.f32.xlu2 %v1003_v25 }
 0xbe3   :  { %v934_v26 = vpop.xlane.xlu0 %933 }
 0xbe4   :  { %v935_v28 = vsub.f32 %v930_v14, %v934_v26 }
 0xbe6   :  { %v936_v30 = vmul.f32 1.442695, %v935_v28 }
 0xbe8   :  { %1972 = vpow2.f32 %v936_v30  ;;  %v624_v30 = vadd.f32 %v2451_v7, %v2406_v29 }
 0xbee   :  { %v1973_v31 = vpop.eup %1972 }
 0xbef   :  { %v938_v33 = vsel %vm215_vm9, %v1973_v31, 0.0 }
 0xbf0   :  { %939 = vadd.xlane.f32.xlu1 %v938_v33  ;;  %1008 = vrot.lane.b32.xlu2 %v2477_v40, %s2076_s2 }
 0xbf6   :  { %v944_v34 = vpop.permute.xlu0 %943 }
 0xbf7   :  { %964 = vmatpush.msrb.mxu1 %v944_v34 }
 0xbf9   :  { %1126 = vmatpush.msra.mxu1 %v1107_v49 }
 0xbfb   :  { %1127 = vmatpush.msra.mxu1 %v1106_v2 }
 0xbfd   :  { %1128 = vmatpush.msra.mxu1 %v1105_v3 }
 0xbff   :  { %1129 = vmatpush.msra.mxu1 %v1104_v4 }
 0xc19   :  { %629 = vadd.xlane.f32.xlu2 %v628_v37 }
 0xc37   :  { %v900_v38 = vpop.f32.mrf.mxu0 }
 0xc38   :  { %v2527_v39 = vadd.f32 %v900_v38, %v2414_v32  ;;  %v1140_v32 = vld [vmem:[%s2801_s19 + $0x18] sm:$0xff] }
 0xc39   :  { %1159 = vmatpush.msra.mxu3 %v1140_v32 }
 0xc3a   :  { %v1065_v41 = vmul.f32 %v2527_v39, %v2527_v39 }
 0xc3b   :  { %1160 = vmatpush.msra.mxu3 %v1139_v0 }
 0xc3c   :  { %v1067_v42 = vsel %vm100_vm0, %v1065_v41, 0.0 }
 0xc3d   :  { %1068 = vadd.xlane.f32.xlu1 %v1067_v42  ;;  %1161 = vmatpush.msra.mxu3 %v1138_v48 }
 0xc3f   :  { %1162 = vmatpush.msra.mxu3 %v1137_v50 }
 0xc4b   :  { %v1005_v40 = vpop.xlane.xlu2 %1004 }
 0xc4c   :  { %1974 = vrcp.f32 %v1005_v40 }
 0xc52   :  { %v1975_v43 = vpop.eup %1974 }
 0xc53   :  { %v1007_v44 = vmul.f32 %v1975_v43, %v1971_v24  ;;  %v1009_v45 = vpop.permute.xlu2 %1008 }
 0xc54   :  { %1029 = vmatpush.msra.mxu0 %v1009_v45 }
 0xc55   :  { %1870 = vmatmul.msk.f32.vlgmr.msra.gmra.mxu0 %vm215_vm9, %v1007_v44 }
 0xc63   :  { %v940_v36 = vpop.xlane.xlu1 %939 }
 0xc64   :  { %1976 = vrcp.f32 %v940_v36 }
 0xc6a   :  { %v1977_v6 = vpop.eup %1976 }
 0xc6b   :  { %v942_v47 = vmul.f32 %v1977_v6, %v1973_v31  ;;  %v627_v31 = vmul.f32 %v624_v30, %v624_v30 }
 0xc6d   :  { %1867 = vmatmul.msk.f32.vlgmr.msrb.gmra.mxu1 %vm215_vm9, %v942_v47  ;;  %v631_v33 = vsel %vm100_vm0, %v627_v31, 0.0 }
 0xc8c   :  { %v630_v51 = vpop.xlane.xlu2 %629 }
 0xc8d   :  { %v634_v52 = vmul.f32 %v630_v51, %v2252_v15 }
 0xc8f   :  { %v636_v53 = vadd.f32 1e-06, %v634_v52 }
 0xc91   :  { %1978 = vrsqrt.f32 %v636_v53  ;;  %vm644_vm11 = vweird.f32 %v636_v53 }
 0xc97   :  { %v1979_v54 = vpop.eup %1978 }
 0xc98   :  { %v639_v55 = vmul.f32 %v1979_v54, %v636_v53  ;;  %vm645_vm10 = vweird.f32 %v1979_v54 }
 0xc99   :  { %vm646_vm12 = vmor %vm644_vm11, %vm645_vm10 }
 0xc9a   :  { %v640_v57 = vmul.f32 %v1979_v54, %v639_v55 }
 0xc9c   :  { %v641_v58 = vmul.f32 0.5, %v640_v57 }
 0xc9e   :  { %v642_v59 = vsub.f32 1.5, %v641_v58 }
 0xca0   :  { %v643_v60 = vmul.f32 %v1979_v54, %v642_v59 }
 0xca2   :  { %v647_v62 = vsel %vm646_vm12, %v1979_v54, %v643_v60 }
 0xca3   :  { %v658_v63 = vmul.f32 %v647_v62, %v623_v35 }
 0xca5   :  { %v663_v1 = vmul.f32 %v2550_v61, %v658_v63 }
 0xca7   :  { %1874 = vmatmul.msk.f32.vlgmr.msra.gmra.mxu3 %vm100_vm0, %v663_v1 }
 0xcb0   :  { %v1069_v5 = vpop.xlane.xlu1 %1068 }
 0xcb1   :  { %v1073_v8 = vmul.f32 %v1069_v5, %v2252_v15 }
 0xcb3   :  { %v1075_v9 = vadd.f32 1e-06, %v1073_v8 }
 0xcb5   :  { %1980 = vrsqrt.f32 %v1075_v9  ;;  %vm1083_vm15 = vweird.f32 %v1075_v9 }
 0xcbb   :  { %v1981_v10 = vpop.eup %1980 }
 0xcbc   :  { %v1078_v11 = vmul.f32 %v1981_v10, %v1075_v9  ;;  %vm1084_vm14 = vweird.f32 %v1981_v10 }
 0xcbd   :  { %vm1085_vm1 = vmor %vm1083_vm15, %vm1084_vm14 }
 0xcbe   :  { %v1079_v12 = vmul.f32 %v1981_v10, %v1078_v11 }
 0xcc0   :  { %v1080_v14 = vmul.f32 0.5, %v1079_v12 }
 0xcc2   :  { %v1081_v16 = vsub.f32 1.5, %v1080_v14 }
 0xcc4   :  { %v1082_v17 = vmul.f32 %v1981_v10, %v1081_v16 }
 0xcc6   :  { %v1086_v19 = vsel %vm1085_vm1, %v1981_v10, %v1082_v17 }
 0xcc7   :  { %v1097_v20 = vmul.f32 %v1086_v19, %v2527_v39 }
 0xcc9   :  { %v1102_v21 = vmul.f32 %v2570_v18, %v1097_v20 }
 0xccb   :  { %1872 = vmatmul.msk.f32.vlgmr.msra.gmra.mxu1 %vm100_vm0, %v1102_v21 }
 0xcd2   :  { %v1031_v22 = vpop.f32.mrf.mxu0 }
 0xcd3   :  { %1035 = vrot.lane.b32.xlu1 %v1031_v22, %s2078_s7 }
 0xcea   :  { %v966_v24 = vpop.f32.mrf.mxu1 }
 0xd2a   :  { %v2576_v23 = vpop.f32.mrf.mxu3 }
 0xd2b   :  { %1239 = vrot.lane.b32.xlu0 %v2576_v23, %s2073_s8  ;;  %1876 = vmatpush.xpose.msk.msrb.mxu0 %vm190_vm8, %v2576_v23 }
 0xd45   :  { %v1036_v25 = vpop.permute.xlu1 %1035 }
 0xd46   :  { %v1038_v26 = vsel %vm190_vm8, %v966_v24, %v1036_v25 }
 0xd47   :  { %1871 = vmatmul.msk.f32.vlgmr.msra.gmra.mxu2 %vm100_vm0, %v1038_v26 }
 0xd48   :  { %v1131_v28 = vpop.f32.mrf.mxu1 }
 0xd49   :  { %1237 = vrot.lane.b32.xlu0 %v1131_v28, %s2073_s8  ;;  %1877 = vmatmul.msk.f32.vlgmr.msrb.gmra.mxu0 %vm190_vm8, %v1131_v28 }
 0xd73   :  { %632 = vadd.xlane.f32.xlu0 %v631_v33 }
 0xd87   :  { %1211 = vrot.lane.b32.xlu0 %v2576_v23, %s2074_s30 }
 0xd9d   :  { %v1240_v34 = vpop.permute.xlu0 %1239 }
 0xd9e   :  { %1879 = vmatpush.xpose.msk.msra.mxu0 %vm190_vm8, %v1240_v34  ;;  %v1173_v34 = vld [vmem:[%s2802_s20 + $0x18] sm:$0xff] }
 0xd9f   :  { %1322 = vmatpush.msrb.mxu1 %v1173_v34 }
 0xdbb   :  { %v1238_v35 = vpop.permute.xlu0 %1237 }
 0xdbc   :  { %1880 = vmatmul.msk.f32.vlgmr.msra.gmra.mxu0 %vm190_vm8, %v1238_v35  ;;  %v1172_v35 = vld [vmem:[%s2802_s20 + $0x10] sm:$0xff] }
 0xdbd   :  { %1323 = vmatpush.msrb.mxu1 %v1172_v35 }
 0xdc6   :  { %v1197_v13 = vpop.f32.mrf.mxu0 }
 0xdc7   :  { %v1198_v37 = vadd.f32 %v2280_v46, %v1197_v13  ;;  %v1171_v13 = vld [vmem:[%s2802_s20 + $0x8] sm:$0xff] }
 0xdc8   :  { %1324 = vmatpush.msrb.mxu1 %v1171_v13 }
 0xdc9   :  { %v1200_v38 = vsel %vm215_vm9, %v1198_v37, -inf }
 0xdca   :  { %1201 = vmax.xlane.f32.xlu2 %v1200_v38  ;;  %v1059_v29 = vpop.f32.mrf.mxu2 }
 0xdcb   :  { %v2596_v7 = vadd.f32 %v1059_v29, %v2438_v56 }
 0xdcd   :  { %v1066_v41 = vmul.f32 %v2596_v7, %v2596_v7 }
 0xdcf   :  { %v1070_v42 = vsel %vm100_vm0, %v1066_v41, 0.0 }
 0xdd0   :  { %1071 = vadd.xlane.f32.xlu1 %v1070_v42 }
 0xde6   :  { %v633_v40 = vpop.xlane.xlu0 %632 }
 0xde7   :  { %v635_v43 = vmul.f32 %v633_v40, %v2252_v15 }
 0xde9   :  { %v637_v44 = vadd.f32 1e-06, %v635_v43 }
 0xdeb   :  { %1982 = vrsqrt.f32 %v637_v44  ;;  %vm654_vm3 = vweird.f32 %v637_v44 }
 0xdf1   :  { %v1983_v45 = vpop.eup %1982 }
 0xdf2   :  { %v649_v36 = vmul.f32 %v1983_v45, %v637_v44  ;;  %vm655_vm2 = vweird.f32 %v1983_v45 }
 0xdf3   :  { %vm656_vm4 = vmor %vm654_vm3, %vm655_vm2 }
 0xdf4   :  { %v650_v6 = vmul.f32 %v1983_v45, %v649_v36 }
 0xdf6   :  { %v651_v47 = vmul.f32 0.5, %v650_v6 }
 0xdf8   :  { %v652_v32 = vsub.f32 1.5, %v651_v47 }
 0xdf9   :  { %v1212_v0 = vpop.permute.xlu0 %1211 }
 0xdfa   :  { %v653_v56 = vmul.f32 %v1983_v45, %v652_v32  ;;  %1232 = vmatpush.msrb.mxu2 %v1212_v0 }
 0xdfc   :  { %v657_v48 = vsel %vm656_vm4, %v1983_v45, %v653_v56 }
 0xdfd   :  { %v659_v50 = vmul.f32 %v657_v48, %v624_v30 }
 0xdff   :  { %v664_v51 = vmul.f32 %v2550_v61, %v659_v50 }
 0xe01   :  { %1875 = vmatmul.msk.f32.gmra.mxu3 %vm100_vm0, %v664_v51 }
 0xe39   :  { %v1262_v52 = vpop.f32.mrf.mxu0 }
 0xe3a   :  { %v1263_v53 = vadd.f32 %v2280_v46, %v1262_v52 }
 0xe3c   :  { %v1265_v54 = vsel %vm215_vm9, %v1263_v53, -inf }
 0xe3d   :  { %1266 = vmax.xlane.f32.xlu2 %v1265_v54  ;;  %v1202_v55 = vpop.xlane.xlu2 %1201 }
 0xe3e   :  { %v1203_v57 = vsub.f32 %v1198_v37, %v1202_v55  ;;  %v1170_v37 = vld [vmem:[%s2802_s20] sm:$0xff]  ;;  %s1820_s20 = sshll.u32 %s2084_s26, 4  ;;  %s1821_s20 = int_to_ptr.vmem [resolvable:$true] %s1820_s20 }
 0xe3f   :  { %1325 = vmatpush.msrb.mxu1 %v1170_v37 }
 0xe40   :  { %v1204_v58 = vmul.f32 1.442695, %v1203_v57 }
 0xe42   :  { %1984 = vpow2.f32 %v1204_v58 }
 0xe43   :  { %v1072_v59 = vpop.xlane.xlu1 %1071 }
 0xe44   :  { %v1074_v60 = vmul.f32 %v1072_v59, %v2252_v15 }
 0xe46   :  { %v1076_v62 = vadd.f32 1e-06, %v1074_v60 }
 0xe48   :  { %v1985_v63 = vpop.eup %1984  ;;  %1986 = vrsqrt.f32 %v1076_v62  ;;  %vm1093_vm6 = vweird.f32 %v1076_v62 }
 0xe49   :  { %v1206_v61 = vsel %vm215_vm9, %v1985_v63, 0.0 }
 0xe4a   :  { %1207 = vadd.xlane.f32.xlu2 %v1206_v61 }
 0xe4e   :  { %v1987_v49 = vpop.eup %1986 }
 0xe4f   :  { %v1088_v1 = vmul.f32 %v1987_v49, %v1076_v62  ;;  %vm1094_vm5 = vweird.f32 %v1987_v49 }
 0xe50   :  { %vm1095_vm7 = vmor %vm1093_vm6, %vm1094_vm5 }
 0xe51   :  { %v1089_v2 = vmul.f32 %v1987_v49, %v1088_v1  ;;  %v1529_v1 = vld [vmem:[%s2804_s22 + $0x8] sm:$0xff] }
 0xe53   :  { %v1090_v46 = vmul.f32 0.5, %v1089_v2  ;;  %v1528_v2 = vld [vmem:[%s2804_s22] sm:$0xff] }
 0xe55   :  { %v1091_v3 = vsub.f32 1.5, %v1090_v46 }
 0xe57   :  { %v1092_v4 = vmul.f32 %v1987_v49, %v1091_v3 }
 0xe59   :  { %v1096_v5 = vsel %vm1095_vm7, %v1987_v49, %v1092_v4  ;;  %v1530_v49 = vld [vmem:[%s2804_s22 + $0x10] sm:$0xff] }
 0xe5a   :  { %v1098_v8 = vmul.f32 %v1096_v5, %v2596_v7 }
 0xe5c   :  { %v1103_v9 = vmul.f32 %v2570_v18, %v1098_v8 }
 0xe5e   :  { %1873 = vmatmul.msk.f32.gmra.mxu1 %vm100_vm0, %v1103_v9 }
 0xe84   :  { %v2611_v10 = vpop.f32.mrf.mxu3 }
 0xe85   :  { %1395 = vrot.lane.b32.xlu1 %v2611_v10, %s2073_s8  ;;  %1883 = vmatpush.xpose.msk.msrb.mxu3 %vm190_vm8, %v2611_v10 }
 0xe89   :  { %1478 = vmatpush.msra.mxu3 %v1173_v34 }
 0xe8b   :  { %1479 = vmatpush.msra.mxu3 %v1172_v35 }
 0xe8d   :  { %1480 = vmatpush.msra.mxu3 %v1171_v13 }
 0xe8f   :  { %1481 = vmatpush.msra.mxu3 %v1170_v37 }
 0xeb0   :  { %v1267_v11 = vpop.xlane.xlu2 %1266 }
 0xeb1   :  { %v1268_v12 = vsub.f32 %v1263_v53, %v1267_v11 }
 0xeb3   :  { %v1269_v14 = vmul.f32 1.442695, %v1268_v12 }
 0xeb5   :  { %1988 = vpow2.f32 %v1269_v14 }
 0xebb   :  { %v1989_v16 = vpop.eup %1988 }
 0xebc   :  { %v1271_v17 = vsel %vm215_vm9, %v1989_v16, 0.0 }
 0xebd   :  { %1272 = vadd.xlane.f32.xlu2 %v1271_v17  ;;  %v1208_v19 = vpop.xlane.xlu2 %1207 }
 0xebe   :  { %1990 = vrcp.f32 %v1208_v19 }
 0xec4   :  { %v1991_v18 = vpop.eup %1990 }
 0xec5   :  { %v1210_v20 = vmul.f32 %v1991_v18, %v1985_v63 }
 0xec7   :  { %1878 = vmatmul.msk.f32.vlgmr.msrb.gmra.mxu2 %vm215_vm9, %v1210_v20  ;;  %v1570_v20 = vld [vmem:[%s2805_s23 + $0x38] sm:$0xff] }
 0xed5   :  { %1276 = vrot.lane.b32.xlu2 %v2576_v23, %s2075_s9 }
 0xedb   :  { %v1134_v21 = vpop.f32.mrf.mxu1 }
 0xedc   :  { %1393 = vrot.lane.b32.xlu0 %v1134_v21, %s2073_s8  ;;  %1884 = vmatmul.msk.f32.vlgmr.msrb.gmra.mxu3 %vm190_vm8, %v1134_v21  ;;  %v1569_v21 = vld [vmem:[%s2805_s23 + $0x30] sm:$0xff] }
 0xef7   :  { %v1396_v28 = vpop.permute.xlu1 %1395 }
 0xf30   :  { %v1273_v22 = vpop.xlane.xlu2 %1272 }
 0xf31   :  { %1992 = vrcp.f32 %v1273_v22  ;;  %v1568_v22 = vld [vmem:[%s2805_s23 + $0x28] sm:$0xff] }
 0xf37   :  { %v1993_v24 = vpop.eup %1992 }
 0xf38   :  { %v1275_v25 = vmul.f32 %v1993_v24, %v1989_v16  ;;  %v1277_v26 = vpop.permute.xlu2 %1276  ;;  %v1930_v16 = vld [vmem:[%s2803_s21] ss:$0 sm:$0xff] }
 0xf39   :  { %1297 = vmatpush.msra.mxu2 %v1277_v26  ;;  %v1567_v24 = vld [vmem:[%s2805_s23 + $0x20] sm:$0xff]  ;;  %v1565_v26 = vld [vmem:[%s2805_s23 + $0x10] sm:$0xff] }
 0xf3a   :  { %1881 = vmatmul.msk.f32.vlgmr.msra.gmra.mxu2 %vm215_vm9, %v1275_v25  ;;  %v1566_v25 = vld [vmem:[%s2805_s23 + $0x18] sm:$0xff] }
 0xf3b   :  { %1886 = vmatpush.xpose.msk.msrb.mxu2 %vm190_vm8, %v1396_v28 }
 0xf3f   :  { %1585 = vmatpush.msra.mxu2 %v1570_v20 }
 0xf41   :  { %1586 = vmatpush.msra.mxu2 %v1569_v21 }
 0xf43   :  { %1587 = vmatpush.msra.mxu2 %v1568_v22 }
 0xf45   :  { %1588 = vmatpush.msra.mxu2 %v1567_v24 }
 0xf47   :  { %1589 = vmatpush.msra.mxu2 %v1566_v25 }
 0xf49   :  { %1590 = vmatpush.msra.mxu2 %v1565_v26 }
 0xf4a   :  { %v1234_v38 = vpop.f32.mrf.mxu2 }
 0xf4e   :  { %v1394_v30 = vpop.permute.xlu0 %1393 }
 0xf4f   :  { %1887 = vmatmul.msk.f32.vlgmr.msrb.gmra.mxu2 %vm190_vm8, %v1394_v30 }
 0xf5f   :  { %v1353_v23 = vpop.f32.mrf.mxu3 }
 0xf60   :  { %v1354_v31 = vadd.f32 %v2337_v27, %v1353_v23 }
 0xf62   :  { %v1356_v33 = vsel %vm215_vm9, %v1354_v31, -inf }
 0xf63   :  { %1357 = vmax.xlane.f32.xlu0 %v1356_v33  ;;  %v1563_v33 = vld [vmem:[%s2805_s23] sm:$0xff] }
 0xf77   :  { %1432 = vrot.lane.b32.xlu0 %v2611_v10, %s2075_s9 }
 0xfbd   :  { %v1299_v29 = vpop.f32.mrf.mxu2 }
 0xfd2   :  { %v1418_v41 = vpop.f32.mrf.mxu2 }
 0xfd3   :  { %v1419_v42 = vadd.f32 %v2337_v27, %v1418_v41 }
 0xfd5   :  { %v1421_v40 = vsel %vm215_vm9, %v1419_v42, -inf }
 0xfd6   :  { %1422 = vmax.xlane.f32.xlu2 %v1421_v40  ;;  %v1358_v43 = vpop.xlane.xlu0 %1357 }
 0xfd7   :  { %v1359_v6 = vsub.f32 %v1354_v31, %v1358_v43  ;;  %v1564_v31 = vld [vmem:[%s2805_s23 + $0x8] sm:$0xff]  ;;  %s2083_s23 = smov 8  }
 0xfd8   :  { %1591 = vmatpush.msra.mxu2 %v1564_v31 }
 0xfd9   :  { %v1360_v32 = vmul.f32 1.442695, %v1359_v6 }
 0xfda   :  { %1592 = vmatpush.msra.mxu2 %v1563_v33 }
 0xfe9   :  { %v1433_v44 = vpop.permute.xlu0 %1432 }
 0xfea   :  { %1453 = vmatpush.msra.mxu1 %v1433_v44  ;;  %v1651_v44 = vld [vmem:[%s2807_s25 + $0x38] sm:$0xff] }
 0xfee   :  { %1303 = vrot.lane.b32.xlu2 %v1299_v29, %s2078_s7 }
0x1049   :  { %v1423_v45 = vpop.xlane.xlu2 %1422 }
0x104a   :  { %v1424_v36 = vsub.f32 %v1419_v42, %v1423_v45 }
0x104c   :  { %v1425_v47 = vmul.f32 1.442695, %v1424_v36 }
0x104e   :  { %1994 = vpow2.f32 %v1425_v47 }
0x104f   :  { %1996 = vpow2.f32 %v1360_v32 }
0x1051   :  { %v1304_v0 = vpop.permute.xlu2 %1303 }
0x1052   :  { %v1306_v56 = vsel %vm190_vm8, %v1234_v38, %v1304_v0 }
0x1053   :  { %1882 = vmatmul.msk.f32.vlgmr.msrb.gmra.mxu1 %vm100_vm0, %v1306_v56 }
0x1054   :  { %v1995_v27 = vpop.eup %1994  ;;  %1894 = vmatpush.xpose.msk.msrb.mxu1 %vm100_vm0, %v1651_v44  ;;  %v1708_v44 = vld [vmem:[%s2846_s11 + $0x8] sm:$0xff] }
0x1055   :  { %v1427_v48 = vsel %vm215_vm9, %v1995_v27, 0.0  ;;  %v1997_v50 = vpop.eup %1996  ;;  %vm1758_vm7 = vcmp.ne.s32.totalorder %v1708_v44, 4294967196 }
0x1056   :  { %1428 = vadd.xlane.f32.xlu1 %v1427_v48  ;;  %v1362_v51 = vsel %vm215_vm9, %v1997_v50, 0.0 }
0x105e   :  { %1363 = vadd.xlane.f32.xlu1 %v1362_v51 }
0x1077   :  { %1367 = vrot.lane.b32.xlu1 %v2611_v10, %s2074_s30 }
0x10c9   :  { %v1429_v52 = vpop.xlane.xlu1 %1428 }
0x10ca   :  { %1998 = vrcp.f32 %v1429_v52  ;;  %v1650_v52 = vld [vmem:[%s2807_s25 + $0x30] sm:$0xff] }
0x10cb   :  { %1895 = vmatpush.xpose.msk.msrb.mxu1 %vm100_vm0, %v1650_v52  ;;  %v2080_v52 = vmov 0.0  }
0x10d0   :  { %v1999_v53 = vpop.eup %1998  ;;  %v1327_v54 = vpop.f32.mrf.mxu1 }
0x10d1   :  { %v1431_v55 = vmul.f32 %v1999_v53, %v1995_v27  ;;  %v2652_v57 = vadd.f32 %v1327_v54, %v2527_v39  ;;  %v1364_v60 = vpop.xlane.xlu1 %1363  ;;  %v1531_v39 = vld [vmem:[%s2804_s22 + $0x18] sm:$0xff]  ;;  %v1649_v53 = vld [vmem:[%s2807_s25 + $0x28] sm:$0xff]  ;;  %v1648_v54 = vld [vmem:[%s2807_s25 + $0x20] sm:$0xff] }
0x10d2   :  { %2000 = vrcp.f32 %v1364_v60  ;;  %1896 = vmatpush.xpose.msk.msrb.mxu1 %vm100_vm0, %v1649_v53 }
0x10d3   :  { %1888 = vmatmul.msk.f32.vlgmr.msra.gmra.mxu1 %vm215_vm9, %v1431_v55  ;;  %v1489_v58 = vmul.f32 %v2652_v57, %v2652_v57  ;;  %v1647_v55 = vld [vmem:[%s2807_s25 + $0x18] sm:$0xff] }
0x10d5   :  { %v1491_v59 = vsel %vm100_vm0, %v1489_v58, 0.0  ;;  %v1645_v58 = vld [vmem:[%s2807_s25 + $0x8] sm:$0xff] }
0x10d6   :  { %1492 = vadd.xlane.f32.xlu0 %v1491_v59  ;;  %1897 = vmatpush.xpose.msk.msrb.mxu1 %vm100_vm0, %v1648_v54  ;;  %v1644_v59 = vld [vmem:[%s2807_s25] sm:$0xff] }
0x10d8   :  { %v2001_v62 = vpop.eup %2000 }
0x10d9   :  { %v1366_v63 = vmul.f32 %v2001_v62, %v1997_v50 }
0x10da   :  { %1898 = vmatpush.xpose.msk.msrb.mxu1 %vm100_vm0, %v1647_v55 }
0x10e9   :  { %v1368_v61 = vpop.permute.xlu1 %1367 }
0x10ea   :  { %1388 = vmatpush.msrb.mxu0 %v1368_v61 }
0x10eb   :  { %1885 = vmatmul.msk.f32.vlgmr.msrb.gmra.mxu0 %vm215_vm9, %v1366_v63 }
0x10ec   :  { %1550 = vmatpush.msra.mxu0 %v1531_v39 }
0x10ee   :  { %1551 = vmatpush.msra.mxu0 %v1530_v49 }
0x10f0   :  { %1552 = vmatpush.msra.mxu0 %v1529_v1 }
0x10f2   :  { %1553 = vmatpush.msra.mxu0 %v1528_v2 }
0x1149   :  { %v1493_v46 = vpop.xlane.xlu0 %1492 }
0x114a   :  { %v1497_v3 = vmul.f32 %v1493_v46, %v2252_v15 }
0x114c   :  { %v1499_v4 = vadd.f32 1e-06, %v1497_v3  ;;  %v1931_v3 = vld [vmem:[%s2806_s24] ss:$0 sm:$0xff] }
0x114e   :  { %2002 = vrsqrt.f32 %v1499_v4  ;;  %vm1507_vm10 = vweird.f32 %v1499_v4 }
0x1150   :  { %v1455_v5 = vpop.f32.mrf.mxu1 }
0x1151   :  { %1459 = vrot.lane.b32.xlu2 %v1455_v5, %s2078_s7 }
0x1154   :  { %v2003_v8 = vpop.eup %2002 }
0x1155   :  { %v1502_v9 = vmul.f32 %v2003_v8, %v1499_v4  ;;  %vm1508_vm9 = vweird.f32 %v2003_v8 }
0x1156   :  { %vm1509_vm11 = vmor %vm1507_vm10, %vm1508_vm9  ;;  %vm1765_vm9 = vcmask 7168  }
0x1157   :  { %v1503_v10 = vmul.f32 %v2003_v8, %v1502_v9 }
0x1159   :  { %v1504_v11 = vmul.f32 0.5, %v1503_v10 }
0x115b   :  { %v1505_v12 = vsub.f32 1.5, %v1504_v11 }
0x115d   :  { %v1506_v14 = vmul.f32 %v2003_v8, %v1505_v12 }
0x115f   :  { %v1510_v17 = vsel %vm1509_vm11, %v2003_v8, %v1506_v14 }
0x1160   :  { %v1521_v19 = vmul.f32 %v1510_v17, %v2652_v57 }
0x1162   :  { %v1526_v18 = vmul.f32 %v1930_v16, %v1521_v19 }
0x1164   :  { %1890 = vmatmul.msk.f32.vlgmr.msra.gmra.mxu0 %vm100_vm0, %v1526_v18 }
0x1168   :  { %v1390_v28 = vpop.f32.mrf.mxu0 }
0x11ab   :  { %v1460_v30 = vpop.permute.xlu2 %1459 }
0x11ac   :  { %v1462_v23 = vsel %vm190_vm8, %v1390_v28, %v1460_v30 }
0x11ad   :  { %1889 = vmatmul.msk.f32.vlgmr.msra.gmra.mxu3 %vm100_vm0, %v1462_v23 }
0x11e1   :  { %v1555_v34 = vpop.f32.mrf.mxu0 }
0x11e2   :  { %v1561_v35 = vmax.f32 %v1555_v34, 0.0 }
0x11e4   :  { %1892 = vmatmul.msk.f32.vlgmr.msra.gmra.mxu2 %vm593_vm13, %v1561_v35 }
0x1230   :  { %v1483_v13 = vpop.f32.mrf.mxu3 }
0x1231   :  { %v2706_v37 = vadd.f32 %v1483_v13, %v2596_v7 }
0x1233   :  { %v1490_v38 = vmul.f32 %v2706_v37, %v2706_v37 }
0x1235   :  { %v1494_v29 = vsel %vm100_vm0, %v1490_v38, 0.0 }
0x1236   :  { %1495 = vadd.xlane.f32.xlu2 %v1494_v29 }
0x1267   :  { %v1594_v41 = vpop.f32.mrf.mxu2 }
0x1268   :  { %v1600_v42 = vadd.f32 %v1594_v41, %v2652_v57  ;;  %v1646_v57 = vld [vmem:[%s2807_s25 + $0x10] sm:$0xff] }
0x1269   :  { %1899 = vmatpush.xpose.msk.msrb.mxu1 %vm100_vm0, %v1646_v57 }
0x126a   :  { %v1603_v40 = vmul.f32 %v1600_v42, %v1600_v42 }
0x126c   :  { %v1605_v43 = vsel %vm100_vm0, %v1603_v40, 0.0 }
0x126d   :  { %1606 = vadd.xlane.f32.xlu1 %v1605_v43  ;;  %1900 = vmatpush.xpose.msk.msrb.mxu1 %vm100_vm0, %v1645_v58  ;;  %v1707_v43 = vld [vmem:[%s2846_s11] sm:$0xff] }
0x126e   :  { %vm1757_vm6 = vcmp.ne.s32.totalorder %v1707_v43, 4294967196 }
0x126f   :  { %v1906_v57 = vsel %vm1757_vm6, 1.0, %v2080_v52 }
0x1270   :  { %v1775_v58 = vsel %vm1765_vm9, %v1906_v57, 0.0 }
0x1271   :  { %1901 = vmatpush.xpose.msk.msrb.mxu1 %vm100_vm0, %v1644_v59  ;;  %v1907_v59 = vsel %vm1758_vm7, 1.0, %v2080_v52 }
0x12a9   :  { %v1496_v7 = vpop.xlane.xlu2 %1495 }
0x12aa   :  { %v1498_v45 = vmul.f32 %v1496_v7, %v2252_v15 }
0x12ac   :  { %v1500_v36 = vadd.f32 1e-06, %v1498_v45 }
0x12ae   :  { %2004 = vrsqrt.f32 %v1500_v36  ;;  %vm1517_vm12 = vweird.f32 %v1500_v36 }
0x12b4   :  { %v2005_v6 = vpop.eup %2004 }
0x12b5   :  { %v1512_v47 = vmul.f32 %v2005_v6, %v1500_v36  ;;  %vm1518_vm8 = vweird.f32 %v2005_v6 }
0x12b6   :  { %vm1519_vm14 = vmor %vm1517_vm12, %vm1518_vm8 }
0x12b7   :  { %v1513_v32 = vmul.f32 %v2005_v6, %v1512_v47 }
0x12b9   :  { %v1514_v0 = vmul.f32 0.5, %v1513_v32 }
0x12bb   :  { %v1515_v56 = vsub.f32 1.5, %v1514_v0  ;;  %v1733_v0 = vlaneseq }
0x12bd   :  { %v1516_v27 = vmul.f32 %v2005_v6, %v1515_v56 }
0x12bf   :  { %v1520_v48 = vsel %vm1519_vm14, %v2005_v6, %v1516_v27  ;;  %vm1800_vm14 = vcmask 0  }
0x12c0   :  { %v1522_v50 = vmul.f32 %v1520_v48, %v2706_v37  ;;  %v1734_v48 = vand.u32 127, %v1733_v0 }
0x12c2   :  { %v1527_v51 = vmul.f32 %v1930_v16, %v1522_v50 }
0x12c4   :  { %1891 = vmatmul.msk.f32.gmra.mxu0 %vm100_vm0, %v1527_v51 }
0x12e0   :  { %v1607_v60 = vpop.xlane.xlu1 %1606 }
0x12e1   :  { %v1611_v62 = vmul.f32 %v1607_v60, %v2252_v15  ;;  %v1776_v60 = vsel %vm1765_vm9, %v1907_v59, 0.0 }
0x12e3   :  { %v1613_v63 = vadd.f32 1e-06, %v1611_v62  ;;  %v1777_v62 = vadd.f32 %v1776_v60, %v1775_v58 }
0x12e5   :  { %2006 = vrsqrt.f32 %v1613_v63  ;;  %vm1621_vm1 = vweird.f32 %v1613_v63 }
0x12eb   :  { %v2007_v61 = vpop.eup %2006 }
0x12ec   :  { %v1616_v39 = vmul.f32 %v2007_v61, %v1613_v63  ;;  %vm1622_vm15 = vweird.f32 %v2007_v61 }
0x12ed   :  { %vm1623_vm2 = vmor %vm1621_vm1, %vm1622_vm15 }
0x12ee   :  { %v1617_v49 = vmul.f32 %v2007_v61, %v1616_v39 }
0x12f0   :  { %v1618_v1 = vmul.f32 0.5, %v1617_v49 }
0x12f2   :  { %v1619_v2 = vsub.f32 1.5, %v1618_v1 }
0x12f4   :  { %v1620_v46 = vmul.f32 %v2007_v61, %v1619_v2 }
0x12f6   :  { %v1624_v4 = vsel %vm1623_vm2, %v2007_v61, %v1620_v46 }
0x12f7   :  { %v1635_v5 = vmul.f32 %v1624_v4, %v1600_v42  ;;  %v2079_v42 = vmov 0   ;;  %v1778_v4 = vrot.slane %v1777_v62, 4 }
0x12f8   :  { %1921 = vset.pattern.permute.xlu0 %v2079_v42  ;;  %1922 = vset.pattern.permute.xlu1 %v2079_v42 }
0x12f9   :  { %v1640_v8 = vmul.f32 %v1931_v3, %v1635_v5  ;;  %v1779_v5 = vadd.f32 %v1778_v4, %v1777_v62 }
0x12fb   :  { %v1642_v9 = vmul.f32 0.17677669, %v1640_v8  ;;  %v1780_v8 = vrot.slane %v1779_v5, 2 }
0x12fd   :  { %1902 = vmatmul.msk.f32.vlgmr.msrb.gmra.mxu1 %vm100_vm0, %v1642_v9  ;;  %v1781_v9 = vadd.f32 %v1780_v8, %v1779_v5 }
0x1341   :  { %v1558_v10 = vpop.f32.mrf.mxu0 }
0x1342   :  { %v1562_v11 = vmax.f32 %v1558_v10, 0.0  ;;  %v1782_v10 = vrot.slane %v1781_v9, 1 }
0x1344   :  { %1893 = vmatmul.msk.f32.gmra.mxu2 %vm593_vm13, %v1562_v11  ;;  %v1783_v11 = vadd.f32 %v1782_v10, %v1781_v9 }
0x137a   :  { %v1699_v12 = vpop.f32.mrf.mxu1 }
0x137b   :  { %1705 = vst.msk [vmem:[#allocation2] sm:$0xff] %vm593_vm13, %v1699_v12  ;;  %v1709_v14 = vsel %vm593_vm13, %v1699_v12, -inf }
0x137c   :  { %1710 = vmax.xlane.f32.xlu2 %v1709_v14 }
0x13c7   :  { %v1597_v16 = vpop.f32.mrf.mxu2 }
0x13c8   :  { %v1601_v17 = vadd.f32 %v1597_v16, %v2706_v37 }
0x13ca   :  { %v1604_v19 = vmul.f32 %v1601_v17, %v1601_v17 }
0x13cc   :  { %v1608_v18 = vsel %vm100_vm0, %v1604_v19, 0.0 }
0x13cd   :  { %1609 = vadd.xlane.f32.xlu0 %v1608_v18 }
0x13ef   :  { %v1711_v20 = vpop.xlane.xlu2 %1710 }
0x13f0   :  { %v1715_v21 = vsub.f32 %v1699_v12, %v1711_v20  ;;  %v1784_v12 = vmax.f32 %v1783_v11, 1.0 }
0x13f2   :  { %v1717_v22 = vmul.f32 1.442695, %v1715_v21 }
0x13f4   :  { %2008 = vpow2.f32 %v1717_v22 }
0x13fa   :  { %v2009_v24 = vpop.eup %2008 }
0x13fb   :  { %v1721_v25 = vsel %vm593_vm13, %v2009_v24, 0.0 }
0x13fc   :  { %1722 = vadd.xlane.f32.xlu1 %v1721_v25 }
0x1415   :  { %1739 = vperm.xlu1 %1922, %v1708_v44  }
0x1440   :  { %v1610_v26 = vpop.xlane.xlu0 %1609 }
0x1441   :  { %v1612_v28 = vmul.f32 %v1610_v26, %v2252_v15 }
0x1443   :  { %v1614_v30 = vadd.f32 1e-06, %v1612_v28 }
0x1445   :  { %2010 = vrsqrt.f32 %v1614_v30  ;;  %vm1631_vm4 = vweird.f32 %v1614_v30 }
0x144b   :  { %v2011_v23 = vpop.eup %2010 }
0x144c   :  { %v1626_v31 = vmul.f32 %v2011_v23, %v1614_v30  ;;  %vm1632_vm3 = vweird.f32 %v2011_v23 }
0x144d   :  { %vm1633_vm5 = vmor %vm1631_vm4, %vm1632_vm3 }
0x144e   :  { %v1627_v33 = vmul.f32 %v2011_v23, %v1626_v31  ;;  %v1796_v31 = vand.u32 2147483648, %v1784_v12 }
0x1450   :  { %v1628_v34 = vmul.f32 0.5, %v1627_v33 }
0x1452   :  { %v1629_v35 = vsub.f32 1.5, %v1628_v34 }
0x1454   :  { %v1630_v13 = vmul.f32 %v2011_v23, %v1629_v35  ;;  %v1794_v35 = vand.u32 2147483647, %v1784_v12 }
0x1456   :  { %v1634_v37 = vsel %vm1633_vm5, %v2011_v23, %v1630_v13  ;;  %vm1795_vm12 = vcmp.eq.f32.partialorder %v1794_v35, 8.507059e+37 }
0x1457   :  { %v1636_v38 = vmul.f32 %v1634_v37, %v1601_v17  ;;  %v1797_v37 = vor.u32 1.1754944e-38, %v1796_v31 }
0x1459   :  { %v1641_v29 = vmul.f32 %v1931_v3, %v1636_v38 }
0x145b   :  { %v1643_v41 = vmul.f32 0.17677669, %v1641_v29 }
0x145d   :  { %1903 = vmatmul.msk.f32.gmra.mxu1 %vm100_vm0, %v1643_v41 }
0x146f   :  { %v1723_v6 = vpop.xlane.xlu1 %1722 }
0x1487   :  { %v1740_v61 = vpop.permute.xlu1 %1739 }
0x1488   :  { %vm1742_vm10 = vcmp.eq.s32.totalorder %v1734_v48, %v1740_v61 }
0x1489   :  { %v1905_v1 = vsel %vm1742_vm10, 1.0, %v2080_v52 }
0x14da   :  { %v1702_v15 = vpop.f32.mrf.mxu1 }
0x14db   :  { %1706 = vst.msk [vmem:[#allocation2 + $0x8] sm:$0xff] %vm593_vm13, %v1702_v15  ;;  %v1712_v40 = vsel %vm593_vm13, %v1702_v15, -inf }
0x14dc   :  { %1713 = vmax.xlane.f32.xlu0 %v1712_v40  ;;  %1814 = dma.vmem_to_hbm [thread:$0]  %s1807_s10, 256, %s1809_s4, [#allocation3], %s2082_s15, %s2082_s15, %s2083_s23  }
0x14f0   :  { %1736 = vperm.xlu0 %1921, %v1707_v43  }
0x154f   :  { %v1714_v7 = vpop.xlane.xlu0 %1713 }
0x1550   :  { %v1716_v45 = vsub.f32 %v1702_v15, %v1714_v7 }
0x1552   :  { %v1719_v36 = vmul.f32 1.442695, %v1716_v45 }
0x1554   :  { %2012 = vpow2.f32 %v1719_v36 }
0x1555   :  { %2014 = vlog2.f32 %v1723_v6 }
0x155a   :  { %v2013_v47 = vpop.eup %2012 }
0x155b   :  { %v1724_v32 = vsel %vm593_vm13, %v2013_v47, 0.0  ;;  %v2015_v56 = vpop.eup %2014 }
0x155c   :  { %1725 = vadd.xlane.f32.xlu2 %v1724_v32  ;;  %v1728_v27 = vmul.f32 0.6931472, %v2015_v56 }
0x155e   :  { %v1731_v51 = vsub.f32 %v1715_v21, %v1728_v27 }
0x1562   :  { %v1737_v50 = vpop.permute.xlu0 %1736 }
0x1563   :  { %vm1741_vm0 = vcmp.eq.s32.totalorder %v1734_v48, %v1737_v50 }
0x1564   :  { %v1904_v53 = vsel %vm1741_vm0, 1.0, %v2080_v52 }
0x1565   :  { %v1747_v54 = vmul.f32 %v1904_v53, %v1731_v51 }
0x1567   :  { %v1749_v55 = vsel %vm593_vm13, %v1747_v54, 0.0 }
0x1568   :  { %1750 = vadd.xlane.f32.xlu2 %v1749_v55 }
0x15cf   :  { %v1726_v63 = vpop.xlane.xlu2 %1725 }
0x15d0   :  { %2016 = vlog2.f32 %v1726_v63 }
0x15d1   :  { %2018 = vrcp.f32 %v1784_v12 }
0x15d6   :  { %v2017_v39 = vpop.eup %2016 }
0x15d7   :  { %v1730_v49 = vmul.f32 0.6931472, %v2017_v39  ;;  %v2019_v16 = vpop.eup %2018 }
0x15d8   :  { %v1786_v19 = vmul.f32 %v2019_v16, %v1784_v12  ;;  %vm1791_vm11 = vweird.f32 %v2019_v16 }
0x15d9   :  { %v1732_v2 = vsub.f32 %v1716_v45, %v1730_v49 }
0x15da   :  { %v1787_v22 = vsub.f32 1.0, %v1786_v19 }
0x15db   :  { %v1748_v46 = vmul.f32 %v1905_v1, %v1732_v2  ;;  %v1751_v14 = vpop.xlane.xlu2 %1750 }
0x15dc   :  { %v1755_v17 = vsub.f32 0.0, %v1751_v14  ;;  %v1788_v30 = vmul.f32 %v2019_v16, %v1787_v22 }
0x15dd   :  { %v1752_v3 = vsel %vm593_vm13, %v1748_v46, 0.0  ;;  %vm1790_vm13 = vweird.f32 %v1784_v12 }
0x15de   :  { %1753 = vadd.xlane.f32.xlu2 %v1752_v3  ;;  %v1763_v20 = vmul.f32 %v1906_v57, %v1755_v17  ;;  %v1789_v34 = vadd.f32 %v2019_v16, %v1788_v30  ;;  %vm1792_vm8 = vmor %vm1790_vm13, %vm1791_vm11 }
0x15e0   :  { %v1766_v25 = vsel %vm1765_vm9, %v1763_v20, 0.0  ;;  %v1793_v29 = vsel %vm1792_vm8, %v2019_v16, %v1789_v34 }
0x15e1   :  { %v1798_v42 = vsel %vm1795_vm12, %v1797_v37, %v1793_v29 }
0x1651   :  { %v1754_v18 = vpop.xlane.xlu2 %1753 }
0x1652   :  { %v1756_v21 = vsub.f32 0.0, %v1754_v18 }
0x1654   :  { %v1764_v24 = vmul.f32 %v1907_v59, %v1756_v21 }
0x1656   :  { %v1767_v26 = vsel %vm1765_vm9, %v1764_v24, 0.0 }
0x1657   :  { %v1768_v28 = vadd.f32 %v1767_v26, %v1766_v25 }
0x1659   :  { %v1769_v23 = vrot.slane %v1768_v28, 4 }
0x165b   :  { %v1770_v33 = vadd.f32 %v1769_v23, %v1768_v28 }
0x165d   :  { %v1771_v13 = vrot.slane %v1770_v33, 2 }
0x165f   :  { %v1772_v38 = vadd.f32 %v1771_v13, %v1770_v33 }
0x1661   :  { %v1773_v41 = vrot.slane %v1772_v38, 1 }
0x1663   :  { %v1774_v15 = vadd.f32 %v1773_v41, %v1772_v38 }
0x1665   :  { %v1799_v40 = vmul.f32 %v1798_v42, %v1774_v15 }
0x1667   :  { %1801 = vst.msk [vmem:[#allocation4] sm:$0x1] %vm1800_vm14, %v1799_v40 }
0x1668   :  { %1825 = dma.vmem_to_hbm [thread:$0]  %s1821_s20, 16, %s1823_s5, [#allocation5]  }
0x1669   :  { %2068 = dma.done.wait [#allocation3], 256  }
0x166a   :  { %2069 = vsyncadd [#allocation3], 4294967040 }
0x166b   :  { %2070 = dma.done.wait [#allocation5], 16  }
0x166c   :  { %2071 = vsyncadd [#allocation5], 4294967280 }
0x166d   :  { %1834 = vsyncpa [#allocation3], 1 }
0x166e   :  { %1835 = vsyncpa [#allocation5], 1 }

</bundles_post_ra>
